<compile_context>
chip_gen: v7x
topology: tpu7x:2x2x1
jax: 0.10.0
libtpu: 0.0.40
codegen_flags: <defaults>
</compile_context>

<pallas_src>
import math
import functools

import jax
import jax.numpy as jnp
from jax.experimental import pallas as pl
from jax.experimental.pallas import tpu as pltpu


def _round_up(x, m):
    return ((x + m - 1) // m) * m


# ----------------------------------------------------------------------------
# Pallas kernel: T decoder steps (emb MLP + GRU stack + output head) per call
# ----------------------------------------------------------------------------
def _decoder_seq_kernel(
    # scalar prefetch (SMEM) -- consumed by index_maps, unused in the body
    pos_idx_ref,      # (T,) int32
    # inputs (VMEM blocks)
    x_ref,            # (B, In)      current timestep input
    pe_ref,           # (1, H)       pe[pos_idx[t]]
    h0_ref,           # (L, B, H)    initial hidden state
    emb_w_ref,        # (In, H)
    emb_b_ref,        # (1, H)
    emb_g_ref,        # (1, H)       LayerNorm weight
    emb_beta_ref,     # (1, H)       LayerNorm bias
    wih_ref,          # (3L, H, H)   gate-split [r,z,n] input->hidden weights
    whh_ref,          # (3L, H, H)   gate-split [r,z,n] hidden->hidden weights
    b_rz_ref,         # (2L, 1, H)   pre-summed (b_ih + b_hh) for r and z
    b_in_ref,         # (L, 1, H)    input-side n-gate bias
    b_hn_ref,         # (L, 1, H)    hidden-side n-gate bias (scaled by r)
    out1_w_ref,       # (H, H)
    out1_b_ref,       # (1, H)
    out_g_ref,        # (1, H)
    out_beta_ref,     # (1, H)
    out2_w_ref,       # (H, Opad)    zero-padded to lane-dense width
    out2_b_ref,       # (1, Opad)
    # outputs
    pred_ref,         # (B, Opad)    per-timestep prediction (lane-padded)
    hfin_ref,         # (L, B, H)    final hidden state
    # scratch
    h_carry,          # (L, B, H)    hidden state carried across timesteps
    *,
    n_layers,
):
    t = pl.program_id(0)
    num_t = pl.num_programs(0)
    eps = 1e-5

    def layernorm(x, g, b):
        mu = jnp.mean(x, axis=-1, keepdims=True)
        var = jnp.mean((x - mu) * (x - mu), axis=-1, keepdims=True)
        return (x - mu) * jax.lax.rsqrt(var + eps) * g + b

    def leaky_relu(x):
        # The module uses nn.LeakyReLU(0.2) explicitly (not the 0.01 default).
        return jnp.where(x > 0, x, 0.2 * x)

    # ---- initialize the hidden-state carry on the first timestep ----
    @pl.when(t == 0)
    def _():
        h_carry[...] = h0_ref[...]

    # ---- emb: Linear -> LayerNorm -> LeakyReLU, then + positional encoding ----
    h_in = jnp.dot(x_ref[...], emb_w_ref[...], preferred_element_type=jnp.float32)
    h_in = h_in + emb_b_ref[...]
    h_in = leaky_relu(layernorm(h_in, emb_g_ref[...], emb_beta_ref[...]))
    h_in = h_in + pe_ref[...]

    # ---- stacked GRU cells; lane-aligned gate blocks (PyTorch order r, z, n) --
    for i in range(n_layers):
        h_prev = h_carry[i]                                          # (B, H)
        gi_r = jnp.dot(h_in, wih_ref[3 * i + 0], preferred_element_type=jnp.float32)
        gi_z = jnp.dot(h_in, wih_ref[3 * i + 1], preferred_element_type=jnp.float32)
        gi_n = jnp.dot(h_in, wih_ref[3 * i + 2], preferred_element_type=jnp.float32)
        gh_r = jnp.dot(h_prev, whh_ref[3 * i + 0], preferred_element_type=jnp.float32)
        gh_z = jnp.dot(h_prev, whh_ref[3 * i + 1], preferred_element_type=jnp.float32)
        gh_n = jnp.dot(h_prev, whh_ref[3 * i + 2], preferred_element_type=jnp.float32)

        r = jax.nn.sigmoid(gi_r + gh_r + b_rz_ref[2 * i + 0])
        z = jax.nn.sigmoid(gi_z + gh_z + b_rz_ref[2 * i + 1])
        n = jnp.tanh(gi_n + b_in_ref[i] + r * (gh_n + b_hn_ref[i]))
        h_new = (1.0 - z) * n + z * h_prev

        h_carry[i] = h_new
        h_in = h_new

    # ---- output head: Linear -> LayerNorm -> LeakyReLU -> Linear (padded) ----
    o = jnp.dot(h_in, out1_w_ref[...], preferred_element_type=jnp.float32)
    o = o + out1_b_ref[...]
    o = leaky_relu(layernorm(o, out_g_ref[...], out_beta_ref[...]))
    pred_ref[...] = (
        jnp.dot(o, out2_w_ref[...], preferred_element_type=jnp.float32)
        + out2_b_ref[...]
    )

    # ---- write the final hidden state once, on the last timestep ----
    @pl.when(t == num_t - 1)
    def _():
        hfin_ref[...] = h_carry[...]


# ----------------------------------------------------------------------------
# Wrappers
# ----------------------------------------------------------------------------
def text_vae_decoder_step_seq(inputs_seq, pos_idx, h0, pe_table, params, *,
                              n_layers, hidden_size, output_size):
    """Run T decoder steps in ONE pallas_call.

    inputs_seq: (T, B, input_size)  per-step inputs
    pos_idx:    (T,) int32          positional indices p per step
    h0:         (n_layers, B, H)    initial hidden state
    pe_table:   (max_len, H)        positional-encoding table
    Returns (preds (T, B, output_size), h_final (n_layers, B, H)).
    """
    T, B, input_size = inputs_seq.shape
    H = hidden_size
    L = n_layers
    out_pad = params["out2_w"].shape[1]
    pe3 = pe_table.reshape(pe_table.shape[0], 1, H)    # (max_len, 1, H)

    kernel = functools.partial(_decoder_seq_kernel, n_layers=L)

    c2 = lambda t, pidx: (0, 0)
    c3 = lambda t, pidx: (0, 0, 0)

    grid_spec = pltpu.PrefetchScalarGridSpec(
        num_scalar_prefetch=1,
        grid=(T,),
        in_specs=[
            pl.BlockSpec((None, B, input_size), lambda t, pidx: (t, 0, 0)),   # x_t
            pl.BlockSpec((None, 1, H), lambda t, pidx: (pidx[t], 0, 0)),      # pe row
            pl.BlockSpec((L, B, H), c3),                                      # h0
            pl.BlockSpec((input_size, H), c2),                                # emb_w
            pl.BlockSpec((1, H), c2),                                         # emb_b
            pl.BlockSpec((1, H), c2),                                         # emb_ln_g
            pl.BlockSpec((1, H), c2),                                         # emb_ln_b
            pl.BlockSpec((3 * L, H, H), c3),                                  # gru_wih
            pl.BlockSpec((3 * L, H, H), c3),                                  # gru_whh
            pl.BlockSpec((2 * L, 1, H), c3),                                  # gru_b_rz
            pl.BlockSpec((L, 1, H), c3),                                      # gru_b_in
            pl.BlockSpec((L, 1, H), c3),                                      # gru_b_hn
            pl.BlockSpec((H, H), c2),                                         # out1_w
            pl.BlockSpec((1, H), c2),                                         # out1_b
            pl.BlockSpec((1, H), c2),                                         # out_ln_g
            pl.BlockSpec((1, H), c2),                                         # out_ln_b
            pl.BlockSpec((H, out_pad), c2),                                   # out2_w
            pl.BlockSpec((1, out_pad), c2),                                   # out2_b
        ],
        out_specs=(
            pl.BlockSpec((None, B, out_pad), lambda t, pidx: (t, 0, 0)),      # pred_t
            pl.BlockSpec((L, B, H), c3),                                      # h_final
        ),
        scratch_shapes=[pltpu.VMEM((L, B, H), jnp.float32)],                  # h carry
    )

    pred_pad, h_final = pl.pallas_call(
        kernel,
        grid_spec=grid_spec,
        out_shape=(
            jax.ShapeDtypeStruct((T, B, out_pad), jnp.float32),
            jax.ShapeDtypeStruct((L, B, H), jnp.float32),
        ),
        compiler_params=pltpu.CompilerParams(
            dimension_semantics=("arbitrary",),          # recurrence => sequential
            vmem_limit_bytes=32 * 1024 * 1024,
        ),
    )(
        pos_idx.astype(jnp.int32),
        inputs_seq, pe3, h0,
        params["emb_w"], params["emb_b"], params["emb_ln_g"], params["emb_ln_b"],
        params["gru_wih"], params["gru_whh"],
        params["gru_b_rz"], params["gru_b_in"], params["gru_b_hn"],
        params["out1_w"], params["out1_b"], params["out_ln_g"], params["out_ln_b"],
        params["out2_w"], params["out2_b"],
    )
    return pred_pad[:, :, :output_size], h_final


def text_vae_decoder_forward(inputs, last_pred, hidden, p, *, pe_table, params,
                             n_layers, hidden_size, output_size):
    """Single-step forward, matching TextVAEDecoder.forward(inputs, last_pred, hidden, p)."""
    del last_pred  # unused by the PyTorch forward
    preds, h_final = text_vae_decoder_step_seq(
        inputs[None], jnp.asarray([p], dtype=jnp.int32), hidden, pe_table, params,
        n_layers=n_layers, hidden_size=hidden_size, output_size=output_size)
    return preds[0], h_final


# ----------------------------------------------------------------------------
# Deterministic parameter construction (torch-style layout) + kernel-layout prep
# ----------------------------------------------------------------------------
def make_torch_style_params(key, text_size, input_size, hidden_size, output_size,
                            n_layers):
    del text_size  # z2init is not part of forward
    H = hidden_size
    keys = jax.random.split(key, 3 + 4 * n_layers + 1)
    k = iter(range(len(keys)))

    def xavier_normal(kk, shape):       # torch weight layout: (fan_out, fan_in)
        fan_out, fan_in = shape
        std = math.sqrt(2.0 / (fan_in + fan_out))
        return (std * jax.random.normal(kk, shape)).astype(jnp.float32)

    def gru_uniform(kk, shape):
        bound = 1.0 / math.sqrt(H)
        return jax.random.uniform(kk, shape, jnp.float32, -bound, bound)

    p = {
        "emb.weight": xavier_normal(keys[next(k)], (H, input_size)),
        "emb.bias": jnp.zeros((H,), jnp.float32),
        "emb_ln.weight": jnp.ones((H,), jnp.float32),
        "emb_ln.bias": jnp.zeros((H,), jnp.float32),
        "out0.weight": xavier_normal(keys[next(k)], (H, H)),
        "out0.bias": jnp.zeros((H,), jnp.float32),
        "out_ln.weight": jnp.ones((H,), jnp.float32),
        "out_ln.bias": jnp.zeros((H,), jnp.float32),
        "out3.weight": xavier_normal(keys[next(k)], (output_size, H)),
        "out3.bias": jnp.zeros((output_size,), jnp.float32),
    }
    for i in range(n_layers):
        p[f"gru.{i}.weight_ih"] = gru_uniform(keys[next(k)], (3 * H, H))
        p[f"gru.{i}.weight_hh"] = gru_uniform(keys[next(k)], (3 * H, H))
        p[f"gru.{i}.bias_ih"] = gru_uniform(keys[next(k)], (3 * H,))
        p[f"gru.{i}.bias_hh"] = gru_uniform(keys[next(k)], (3 * H,))
    return p


def prepare_kernel_params(tp, *, n_layers, hidden_size, output_size, lane=128):
    """One-time host-side conversion to the kernel-friendly, lane-aligned layout."""
    H = hidden_size
    out_pad = _round_up(max(output_size, lane), lane)

    wih, whh, b_rz, b_in, b_hn = [], [], [], [], []
    for i in range(n_layers):
        w_ih = tp[f"gru.{i}.weight_ih"]           # (3H, H), gate order r,z,n
        w_hh = tp[f"gru.{i}.weight_hh"]
        bi = tp[f"gru.{i}.bias_ih"]
        bh = tp[f"gru.{i}.bias_hh"]
        for g in range(3):
            wih.append(w_ih[g * H:(g + 1) * H, :].T)      # (H, H), x @ W_g
            whh.append(w_hh[g * H:(g + 1) * H, :].T)
        b_rz.append((bi[0:H] + bh[0:H])[None, :])          # r: pre-summed
        b_rz.append((bi[H:2 * H] + bh[2 * H - H:2 * H])[None, :])  # z: pre-summed
        b_in.append(bi[2 * H:3 * H][None, :])
        b_hn.append(bh[2 * H:3 * H][None, :])

    out2_w = jnp.zeros((H, out_pad), jnp.float32).at[:, :output_size].set(
        tp["out3.weight"].T)
    out2_b = jnp.zeros((1, out_pad), jnp.float32).at[0, :output_size].set(
        tp["out3.bias"])

    return {
        "emb_w": tp["emb.weight"].T,
        "emb_b": tp["emb.bias"][None, :],
        "emb_ln_g": tp["emb_ln.weight"][None, :],
        "emb_ln_b": tp["emb_ln.bias"][None, :],
        "gru_wih": jnp.stack(wih, 0),            # (3L, H, H)
        "gru_whh": jnp.stack(whh, 0),            # (3L, H, H)
        "gru_b_rz": jnp.stack(b_rz, 0),          # (2L, 1, H)
        "gru_b_in": jnp.stack(b_in, 0),          # (L, 1, H)
        "gru_b_hn": jnp.stack(b_hn, 0),          # (L, 1, H)
        "out1_w": tp["out0.weight"].T,
        "out1_b": tp["out0.bias"][None, :],
        "out_ln_g": tp["out_ln.weight"][None, :],
        "out_ln_b": tp["out_ln.bias"][None, :],
        "out2_w": out2_w,                        # (H, Opad) zero-padded
        "out2_b": out2_b,                        # (1, Opad) zero-padded
    }


def positional_encoding_table(d_model, max_len=300):
    position = jnp.arange(max_len, dtype=jnp.float32)[:, None]
    div_term = jnp.exp(
        jnp.arange(0, d_model, 2, dtype=jnp.float32) * (-math.log(10000.0) / d_model))
    pe = jnp.zeros((max_len, d_model), jnp.float32)
    pe = pe.at[:, 0::2].set(jnp.sin(position * div_term))
    pe = pe.at[:, 1::2].set(jnp.cos(position * div_term))
    return pe


# ----------------------------------------------------------------------------
# Pure-JAX reference (torch-style params; mirrors the PyTorch math exactly)
# ----------------------------------------------------------------------------
def reference_step(inputs, hidden, pos_row, tp, *, n_layers, hidden_size):
    eps = 1e-5
    H = hidden_size

    def ln(x, g, b):
        mu = jnp.mean(x, -1, keepdims=True)
        var = jnp.mean((x - mu) ** 2, -1, keepdims=True)
        return (x - mu) / jnp.sqrt(var + eps) * g + b

    def lrelu(x):
        return jnp.where(x > 0, x, 0.2 * x)

    h_in = lrelu(ln(inputs @ tp["emb.weight"].T + tp["emb.bias"],
                    tp["emb_ln.weight"], tp["emb_ln.bias"]))
    h_in = h_in + pos_row

    new_h = []
    for i in range(n_layers):
        h_prev = hidden[i]
        gi = h_in @ tp[f"gru.{i}.weight_ih"].T + tp[f"gru.{i}.bias_ih"]
        gh = h_prev @ tp[f"gru.{i}.weight_hh"].T + tp[f"gru.{i}.bias_hh"]
        r = jax.nn.sigmoid(gi[:, :H] + gh[:, :H])
        z = jax.nn.sigmoid(gi[:, H:2 * H] + gh[:, H:2 * H])
        n = jnp.tanh(gi[:, 2 * H:] + r * gh[:, 2 * H:])
        h_new = (1 - z) * n + z * h_prev
        new_h.append(h_new)
        h_in = h_new

    o = lrelu(ln(h_in @ tp["out0.weight"].T + tp["out0.bias"],
                 tp["out_ln.weight"], tp["out_ln.bias"]))
    pred = o @ tp["out3.weight"].T + tp["out3.bias"]
    return pred, jnp.stack(new_h, 0)


# ----------------------------------------------------------------------------
if __name__ == "__main__":
    batch = 2
    text_size = 48        # only used by z2init / get_init_hidden (not in forward)
    input_size = 16
    output_size = 24
    hidden_size = 32
    n_layers = 2
    T = 8                 # decode steps fused into one pallas_call

    key = jax.random.PRNGKey(0)
    k_in, k_seq, k_h, k_lp, k_par = jax.random.split(key, 5)

    inputs = jax.random.normal(k_in, (batch, input_size), jnp.float32)
    inputs_seq = jax.random.normal(k_seq, (T, batch, input_size), jnp.float32)
    hidden0 = jax.random.normal(k_h, (n_layers, batch, hidden_size), jnp.float32)
    last_pred = jax.random.normal(k_lp, (batch, output_size), jnp.float32)  # unused

    torch_params = make_torch_style_params(
        k_par, text_size, input_size, hidden_size, output_size, n_layers)
    kparams = prepare_kernel_params(
        torch_params, n_layers=n_layers, hidden_size=hidden_size,
        output_size=output_size)
    pe_table = positional_encoding_table(hidden_size)

    # --- single step: exact PyTorch forward(inputs, last_pred, hidden, p) ---
    p = 3
    pred1, h1 = text_vae_decoder_forward(
        inputs, last_pred, hidden0, p,
        pe_table=pe_table, params=kparams,
        n_layers=n_layers, hidden_size=hidden_size, output_size=output_size)
    pred1 = jax.block_until_ready(pred1)
    h1 = jax.block_until_ready(h1)

    ref_pred1, ref_h1 = reference_step(
        inputs, hidden0, pe_table[p][None, :], torch_params,
        n_layers=n_layers, hidden_size=hidden_size)
    assert jnp.allclose(pred1, ref_pred1, atol=1e-4, rtol=1e-4)
    assert jnp.allclose(h1, ref_h1, atol=1e-4, rtol=1e-4)

    # --- T autoregressive steps fused in ONE kernel launch ---
    pos_idx = jnp.arange(T, dtype=jnp.int32)
    preds, h_final = text_vae_decoder_step_seq(
        inputs_seq, pos_idx, hidden0, pe_table, kparams,
        n_layers=n_layers, hidden_size=hidden_size, output_size=output_size)
    preds = jax.block_until_ready(preds)
    h_final = jax.block_until_ready(h_final)

    h = hidden0
    ref_preds = []
    for t in range(T):
        pr, h = reference_step(
            inputs_seq[t], h, pe_table[t][None, :], torch_params,
            n_layers=n_layers, hidden_size=hidden_size)
        ref_preds.append(pr)
    ref_preds = jnp.stack(ref_preds, 0)
    assert jnp.allclose(preds, ref_preds, atol=1e-4, rtol=1e-4)
    assert jnp.allclose(h_final, h, atol=1e-4, rtol=1e-4)

    print("KERNEL_OK")
</pallas_src>

<mosaic_0001>
module attributes {stable_mosaic.version = 11 : i64} {
  func.func @_decoder_seq_kernel(%arg0: i32, %arg1: memref<1xi32, #tpu.memory_space<smem>>, %arg2: memref<1x2x16xf32, #tpu.memory_space<vmem>>, %arg3: memref<1x1x32xf32, #tpu.memory_space<vmem>>, %arg4: memref<2x2x32xf32, #tpu.memory_space<vmem>>, %arg5: memref<16x32xf32, #tpu.memory_space<vmem>>, %arg6: memref<1x32xf32, #tpu.memory_space<vmem>>, %arg7: memref<1x32xf32, #tpu.memory_space<vmem>>, %arg8: memref<1x32xf32, #tpu.memory_space<vmem>>, %arg9: memref<6x32x32xf32, #tpu.memory_space<vmem>>, %arg10: memref<6x32x32xf32, #tpu.memory_space<vmem>>, %arg11: memref<4x1x32xf32, #tpu.memory_space<vmem>>, %arg12: memref<2x1x32xf32, #tpu.memory_space<vmem>>, %arg13: memref<2x1x32xf32, #tpu.memory_space<vmem>>, %arg14: memref<32x32xf32, #tpu.memory_space<vmem>>, %arg15: memref<1x32xf32, #tpu.memory_space<vmem>>, %arg16: memref<1x32xf32, #tpu.memory_space<vmem>>, %arg17: memref<1x32xf32, #tpu.memory_space<vmem>>, %arg18: memref<32x128xf32, #tpu.memory_space<vmem>>, %arg19: memref<1x128xf32, #tpu.memory_space<vmem>>, %arg20: memref<1x2x128xf32, #tpu.memory_space<vmem>>, %arg21: memref<2x2x32xf32, #tpu.memory_space<vmem>>, %arg22: memref<2x2x32xf32, #tpu.memory_space<vmem>>) attributes {dimension_semantics = [#tpu.dimension_semantics<arbitrary>], iteration_bounds = array<i64: 1>, scalar_prefetch = 1 : i64, scratch_operands = 1 : i64, tpu.core_type = #tpu.core_type<tc>, window_params = [{transform_indices = @transform_0, window_bounds = array<i64: 1, 2, 16>}, {transform_indices = @transform_1, window_bounds = array<i64: 1, 1, 32>}, {pipeline_mode = #tpu.pipeline_mode<synchronous>, transform_indices = @transform_2, window_bounds = array<i64: 2, 2, 32>}, {pipeline_mode = #tpu.pipeline_mode<synchronous>, transform_indices = @transform_3, window_bounds = array<i64: 16, 32>}, {pipeline_mode = #tpu.pipeline_mode<synchronous>, transform_indices = @transform_4, window_bounds = array<i64: 1, 32>}, {pipeline_mode = #tpu.pipeline_mode<synchronous>, transform_indices = @transform_5, window_bounds = array<i64: 1, 32>}, {pipeline_mode = #tpu.pipeline_mode<synchronous>, transform_indices = @transform_6, window_bounds = array<i64: 1, 32>}, {pipeline_mode = #tpu.pipeline_mode<synchronous>, transform_indices = @transform_7, window_bounds = array<i64: 6, 32, 32>}, {pipeline_mode = #tpu.pipeline_mode<synchronous>, transform_indices = @transform_8, window_bounds = array<i64: 6, 32, 32>}, {pipeline_mode = #tpu.pipeline_mode<synchronous>, transform_indices = @transform_9, window_bounds = array<i64: 4, 1, 32>}, {pipeline_mode = #tpu.pipeline_mode<synchronous>, transform_indices = @transform_10, window_bounds = array<i64: 2, 1, 32>}, {pipeline_mode = #tpu.pipeline_mode<synchronous>, transform_indices = @transform_11, window_bounds = array<i64: 2, 1, 32>}, {pipeline_mode = #tpu.pipeline_mode<synchronous>, transform_indices = @transform_12, window_bounds = array<i64: 32, 32>}, {pipeline_mode = #tpu.pipeline_mode<synchronous>, transform_indices = @transform_13, window_bounds = array<i64: 1, 32>}, {pipeline_mode = #tpu.pipeline_mode<synchronous>, transform_indices = @transform_14, window_bounds = array<i64: 1, 32>}, {pipeline_mode = #tpu.pipeline_mode<synchronous>, transform_indices = @transform_15, window_bounds = array<i64: 1, 32>}, {pipeline_mode = #tpu.pipeline_mode<synchronous>, transform_indices = @transform_16, window_bounds = array<i64: 32, 128>}, {pipeline_mode = #tpu.pipeline_mode<synchronous>, transform_indices = @transform_17, window_bounds = array<i64: 1, 128>}, {transform_indices = @transform_18, window_bounds = array<i64: 1, 2, 128>}, {pipeline_mode = #tpu.pipeline_mode<synchronous>, transform_indices = @transform_19, window_bounds = array<i64: 2, 2, 32>}]} {
    %c0_i32 = arith.constant 0 : i32
    %0 = arith.cmpi eq, %arg0, %c0_i32 : i32
    %1 = arith.extui %0 : i1 to i32
    %c0_i32_0 = arith.constant 0 : i32
    %2 = arith.cmpi ne, %1, %c0_i32_0 : i32
    scf.if %2 {
      %c0_132 = arith.constant 0 : index
      %c0_133 = arith.constant 0 : index
      %c0_134 = arith.constant 0 : index
      %210 = vector.load %arg4[%c0_132, %c0_133, %c0_134] : memref<2x2x32xf32, #tpu.memory_space<vmem>>, vector<2x2x32xf32>
      %c0_135 = arith.constant 0 : index
      %c0_136 = arith.constant 0 : index
      %c0_137 = arith.constant 0 : index
      %211 = vector.load %arg22[%c0_135, %c0_136, %c0_137] : memref<2x2x32xf32, #tpu.memory_space<vmem>>, vector<2x2x32xf32>
      tpu.vector_store %arg22[%c0_135, %c0_136, %c0_137], %210 {strides = array<i32>} : memref<2x2x32xf32, #tpu.memory_space<vmem>>, vector<2x2x32xf32>,
    } else {
    }
    %c0 = arith.constant 0 : index
    %c0_1 = arith.constant 0 : index
    %c0_2 = arith.constant 0 : index
    %3 = vector.load %arg2[%c0, %c0_1, %c0_2] : memref<1x2x16xf32, #tpu.memory_space<vmem>>, vector<1x2x16xf32>
    %4 = vector.shape_cast %3 : vector<1x2x16xf32> to vector<2x16xf32>
    %c0_3 = arith.constant 0 : index
    %c0_4 = arith.constant 0 : index
    %5 = vector.load %arg5[%c0_3, %c0_4] : memref<16x32xf32, #tpu.memory_space<vmem>>, vector<16x32xf32>
    %cst = arith.constant dense<0.000000e+00> : vector<2x32xf32>
    %6 = tpu.matmul %4, %5, %cst {dimension_numbers = #tpu.dot_dimension_numbers<[1], [0], [0], [1], [0, 0, 1, 1], [], []>} : vector<2x16xf32>, vector<16x32xf32>, vector<2x32xf32> -> vector<2x32xf32>
    %c0_5 = arith.constant 0 : index
    %c0_6 = arith.constant 0 : index
    %7 = vector.load %arg6[%c0_5, %c0_6] : memref<1x32xf32, #tpu.memory_space<vmem>>, vector<1x32xf32>
    %8 = vector.broadcast %7 : vector<1x32xf32> to vector<2x32xf32>
    %9 = arith.addf %6, %8 : vector<2x32xf32>
    %c0_7 = arith.constant 0 : index
    %c0_8 = arith.constant 0 : index
    %10 = vector.load %arg7[%c0_7, %c0_8] : memref<1x32xf32, #tpu.memory_space<vmem>>, vector<1x32xf32>
    %c0_9 = arith.constant 0 : index
    %c0_10 = arith.constant 0 : index
    %11 = vector.load %arg8[%c0_9, %c0_10] : memref<1x32xf32, #tpu.memory_space<vmem>>, vector<1x32xf32>
    %cst_11 = arith.constant dense<0.000000e+00> : vector<2xf32>
    %12 = vector.multi_reduction <add>, %9, %cst_11 [1] : vector<2x32xf32> to vector<2xf32>
    %13 = vector.shape_cast %12 : vector<2xf32> to vector<2x1xf32>
    %cst_12 = arith.constant 3.200000e+01 : f32
    %14 = vector.broadcast %cst_12 : f32 to vector<2x1xf32>
    %15 = arith.divf %13, %14 : vector<2x1xf32>
    %16 = vector.broadcast %15 : vector<2x1xf32> to vector<2x32xf32>
    %17 = arith.subf %9, %16 : vector<2x32xf32>
    %18 = vector.broadcast %15 : vector<2x1xf32> to vector<2x32xf32>
    %19 = arith.subf %9, %18 : vector<2x32xf32>
    %20 = arith.mulf %17, %19 : vector<2x32xf32>
    %cst_13 = arith.constant dense<0.000000e+00> : vector<2xf32>
    %21 = vector.multi_reduction <add>, %20, %cst_13 [1] : vector<2x32xf32> to vector<2xf32>
    %22 = vector.shape_cast %21 : vector<2xf32> to vector<2x1xf32>
    %cst_14 = arith.constant 3.200000e+01 : f32
    %23 = vector.broadcast %cst_14 : f32 to vector<2x1xf32>
    %24 = arith.divf %22, %23 : vector<2x1xf32>
    %25 = vector.broadcast %15 : vector<2x1xf32> to vector<2x32xf32>
    %26 = arith.subf %9, %25 : vector<2x32xf32>
    %cst_15 = arith.constant 9.99999974E-6 : f32
    %27 = vector.broadcast %cst_15 : f32 to vector<2x1xf32>
    %28 = arith.addf %24, %27 : vector<2x1xf32>
    %29 = math.rsqrt %28 : vector<2x1xf32>
    %30 = vector.broadcast %29 : vector<2x1xf32> to vector<2x32xf32>
    %31 = arith.mulf %26, %30 : vector<2x32xf32>
    %32 = vector.broadcast %10 : vector<1x32xf32> to vector<2x32xf32>
    %33 = arith.mulf %31, %32 : vector<2x32xf32>
    %34 = vector.broadcast %11 : vector<1x32xf32> to vector<2x32xf32>
    %35 = arith.addf %33, %34 : vector<2x32xf32>
    %cst_16 = arith.constant 0.000000e+00 : f32
    %36 = vector.broadcast %cst_16 : f32 to vector<2x32xf32>
    %37 = arith.cmpf ogt, %35, %36 : vector<2x32xf32>
    %cst_17 = arith.constant 2.000000e-01 : f32
    %38 = vector.broadcast %cst_17 : f32 to vector<2x32xf32>
    %39 = arith.mulf %38, %35 : vector<2x32xf32>
    %40 = arith.select %37, %35, %39 : vector<2x32xi1>, vector<2x32xf32>
    %c0_18 = arith.constant 0 : index
    %c0_19 = arith.constant 0 : index
    %c0_20 = arith.constant 0 : index
    %41 = vector.load %arg3[%c0_18, %c0_19, %c0_20] : memref<1x1x32xf32, #tpu.memory_space<vmem>>, vector<1x1x32xf32>
    %42 = vector.shape_cast %41 : vector<1x1x32xf32> to vector<1x32xf32>
    %43 = vector.broadcast %42 : vector<1x32xf32> to vector<2x32xf32>
    %44 = arith.addf %40, %43 : vector<2x32xf32>
    %c0_21 = arith.constant 0 : index
    %c0_22 = arith.constant 0 : index
    %c0_23 = arith.constant 0 : index
    %45 = vector.load %arg22[%c0_21, %c0_22, %c0_23] : memref<2x2x32xf32, #tpu.memory_space<vmem>>, vector<1x2x32xf32>
    %46 = vector.shape_cast %45 : vector<1x2x32xf32> to vector<2x32xf32>
    %c0_24 = arith.constant 0 : index
    %c0_25 = arith.constant 0 : index
    %c0_26 = arith.constant 0 : index
    %47 = vector.load %arg9[%c0_24, %c0_25, %c0_26] : memref<6x32x32xf32, #tpu.memory_space<vmem>>, vector<1x32x32xf32>
    %48 = vector.shape_cast %47 : vector<1x32x32xf32> to vector<32x32xf32>
    %cst_27 = arith.constant dense<0.000000e+00> : vector<2x32xf32>
    %49 = tpu.matmul %44, %48, %cst_27 {dimension_numbers = #tpu.dot_dimension_numbers<[1], [0], [0], [1], [0, 0, 1, 1], [], []>} : vector<2x32xf32>, vector<32x32xf32>, vector<2x32xf32> -> vector<2x32xf32>
    %c1 = arith.constant 1 : index
    %c0_28 = arith.constant 0 : index
    %c0_29 = arith.constant 0 : index
    %50 = vector.load %arg9[%c1, %c0_28, %c0_29] : memref<6x32x32xf32, #tpu.memory_space<vmem>>, vector<1x32x32xf32>
    %51 = vector.shape_cast %50 : vector<1x32x32xf32> to vector<32x32xf32>
    %cst_30 = arith.constant dense<0.000000e+00> : vector<2x32xf32>
    %52 = tpu.matmul %44, %51, %cst_30 {dimension_numbers = #tpu.dot_dimension_numbers<[1], [0], [0], [1], [0, 0, 1, 1], [], []>} : vector<2x32xf32>, vector<32x32xf32>, vector<2x32xf32> -> vector<2x32xf32>
    %c2 = arith.constant 2 : index
    %c0_31 = arith.constant 0 : index
    %c0_32 = arith.constant 0 : index
    %53 = vector.load %arg9[%c2, %c0_31, %c0_32] : memref<6x32x32xf32, #tpu.memory_space<vmem>>, vector<1x32x32xf32>
    %54 = vector.shape_cast %53 : vector<1x32x32xf32> to vector<32x32xf32>
    %cst_33 = arith.constant dense<0.000000e+00> : vector<2x32xf32>
    %55 = tpu.matmul %44, %54, %cst_33 {dimension_numbers = #tpu.dot_dimension_numbers<[1], [0], [0], [1], [0, 0, 1, 1], [], []>} : vector<2x32xf32>, vector<32x32xf32>, vector<2x32xf32> -> vector<2x32xf32>
    %c0_34 = arith.constant 0 : index
    %c0_35 = arith.constant 0 : index
    %c0_36 = arith.constant 0 : index
    %56 = vector.load %arg10[%c0_34, %c0_35, %c0_36] : memref<6x32x32xf32, #tpu.memory_space<vmem>>, vector<1x32x32xf32>
    %57 = vector.shape_cast %56 : vector<1x32x32xf32> to vector<32x32xf32>
    %cst_37 = arith.constant dense<0.000000e+00> : vector<2x32xf32>
    %58 = tpu.matmul %46, %57, %cst_37 {dimension_numbers = #tpu.dot_dimension_numbers<[1], [0], [0], [1], [0, 0, 1, 1], [], []>} : vector<2x32xf32>, vector<32x32xf32>, vector<2x32xf32> -> vector<2x32xf32>
    %c1_38 = arith.constant 1 : index
    %c0_39 = arith.constant 0 : index
    %c0_40 = arith.constant 0 : index
    %59 = vector.load %arg10[%c1_38, %c0_39, %c0_40] : memref<6x32x32xf32, #tpu.memory_space<vmem>>, vector<1x32x32xf32>
    %60 = vector.shape_cast %59 : vector<1x32x32xf32> to vector<32x32xf32>
    %cst_41 = arith.constant dense<0.000000e+00> : vector<2x32xf32>
    %61 = tpu.matmul %46, %60, %cst_41 {dimension_numbers = #tpu.dot_dimension_numbers<[1], [0], [0], [1], [0, 0, 1, 1], [], []>} : vector<2x32xf32>, vector<32x32xf32>, vector<2x32xf32> -> vector<2x32xf32>
    %c2_42 = arith.constant 2 : index
    %c0_43 = arith.constant 0 : index
    %c0_44 = arith.constant 0 : index
    %62 = vector.load %arg10[%c2_42, %c0_43, %c0_44] : memref<6x32x32xf32, #tpu.memory_space<vmem>>, vector<1x32x32xf32>
    %63 = vector.shape_cast %62 : vector<1x32x32xf32> to vector<32x32xf32>
    %cst_45 = arith.constant dense<0.000000e+00> : vector<2x32xf32>
    %64 = tpu.matmul %46, %63, %cst_45 {dimension_numbers = #tpu.dot_dimension_numbers<[1], [0], [0], [1], [0, 0, 1, 1], [], []>} : vector<2x32xf32>, vector<32x32xf32>, vector<2x32xf32> -> vector<2x32xf32>
    %65 = arith.addf %49, %58 : vector<2x32xf32>
    %c0_46 = arith.constant 0 : index
    %c0_47 = arith.constant 0 : index
    %c0_48 = arith.constant 0 : index
    %66 = vector.load %arg11[%c0_46, %c0_47, %c0_48] : memref<4x1x32xf32, #tpu.memory_space<vmem>>, vector<1x1x32xf32>
    %67 = vector.shape_cast %66 : vector<1x1x32xf32> to vector<1x32xf32>
    %68 = vector.broadcast %67 : vector<1x32xf32> to vector<2x32xf32>
    %69 = arith.addf %65, %68 : vector<2x32xf32>
    %70 = arith.negf %69 : vector<2x32xf32>
    %71 = math.exp %70 : vector<2x32xf32>
    %cst_49 = arith.constant 1.000000e+00 : f32
    %72 = vector.broadcast %cst_49 : f32 to vector<2x32xf32>
    %73 = arith.addf %72, %71 : vector<2x32xf32>
    %74 = arith.divf %72, %73 : vector<2x32xf32>
    %75 = arith.addf %52, %61 : vector<2x32xf32>
    %c1_50 = arith.constant 1 : index
    %c0_51 = arith.constant 0 : index
    %c0_52 = arith.constant 0 : index
    %76 = vector.load %arg11[%c1_50, %c0_51, %c0_52] : memref<4x1x32xf32, #tpu.memory_space<vmem>>, vector<1x1x32xf32>
    %77 = vector.shape_cast %76 : vector<1x1x32xf32> to vector<1x32xf32>
    %78 = vector.broadcast %77 : vector<1x32xf32> to vector<2x32xf32>
    %79 = arith.addf %75, %78 : vector<2x32xf32>
    %80 = arith.negf %79 : vector<2x32xf32>
    %81 = math.exp %80 : vector<2x32xf32>
    %cst_53 = arith.constant 1.000000e+00 : f32
    %82 = vector.broadcast %cst_53 : f32 to vector<2x32xf32>
    %83 = arith.addf %82, %81 : vector<2x32xf32>
    %84 = arith.divf %82, %83 : vector<2x32xf32>
    %c0_54 = arith.constant 0 : index
    %c0_55 = arith.constant 0 : index
    %c0_56 = arith.constant 0 : index
    %85 = vector.load %arg12[%c0_54, %c0_55, %c0_56] : memref<2x1x32xf32, #tpu.memory_space<vmem>>, vector<1x1x32xf32>
    %86 = vector.shape_cast %85 : vector<1x1x32xf32> to vector<1x32xf32>
    %87 = vector.broadcast %86 : vector<1x32xf32> to vector<2x32xf32>
    %88 = arith.addf %55, %87 : vector<2x32xf32>
    %c0_57 = arith.constant 0 : index
    %c0_58 = arith.constant 0 : index
    %c0_59 = arith.constant 0 : index
    %89 = vector.load %arg13[%c0_57, %c0_58, %c0_59] : memref<2x1x32xf32, #tpu.memory_space<vmem>>, vector<1x1x32xf32>
    %90 = vector.shape_cast %89 : vector<1x1x32xf32> to vector<1x32xf32>
    %91 = vector.broadcast %90 : vector<1x32xf32> to vector<2x32xf32>
    %92 = arith.addf %64, %91 : vector<2x32xf32>
    %93 = arith.mulf %74, %92 : vector<2x32xf32>
    %94 = arith.addf %88, %93 : vector<2x32xf32>
    %95 = math.tanh %94 : vector<2x32xf32>
    %cst_60 = arith.constant 1.000000e+00 : f32
    %96 = vector.broadcast %cst_60 : f32 to vector<2x32xf32>
    %97 = arith.subf %96, %84 : vector<2x32xf32>
    %98 = arith.mulf %97, %95 : vector<2x32xf32>
    %99 = arith.mulf %84, %46 : vector<2x32xf32>
    %100 = arith.addf %98, %99 : vector<2x32xf32>
    %c0_61 = arith.constant 0 : index
    %c0_62 = arith.constant 0 : index
    %c0_63 = arith.constant 0 : index
    %101 = vector.load %arg22[%c0_61, %c0_62, %c0_63] : memref<2x2x32xf32, #tpu.memory_space<vmem>>, vector<1x2x32xf32>
    %102 = vector.shape_cast %101 : vector<1x2x32xf32> to vector<2x32xf32>
    %103 = vector.shape_cast %100 : vector<2x32xf32> to vector<1x2x32xf32>
    tpu.vector_store %arg22[%c0_61, %c0_62, %c0_63], %103 {strides = array<i32>} : memref<2x2x32xf32, #tpu.memory_space<vmem>>, vector<1x2x32xf32>,
    %c1_64 = arith.constant 1 : index
    %c0_65 = arith.constant 0 : index
    %c0_66 = arith.constant 0 : index
    %104 = vector.load %arg22[%c1_64, %c0_65, %c0_66] : memref<2x2x32xf32, #tpu.memory_space<vmem>>, vector<1x2x32xf32>
    %105 = vector.shape_cast %104 : vector<1x2x32xf32> to vector<2x32xf32>
    %c3 = arith.constant 3 : index
    %c0_67 = arith.constant 0 : index
    %c0_68 = arith.constant 0 : index
    %106 = vector.load %arg9[%c3, %c0_67, %c0_68] : memref<6x32x32xf32, #tpu.memory_space<vmem>>, vector<1x32x32xf32>
    %107 = vector.shape_cast %106 : vector<1x32x32xf32> to vector<32x32xf32>
    %cst_69 = arith.constant dense<0.000000e+00> : vector<2x32xf32>
    %108 = tpu.matmul %100, %107, %cst_69 {dimension_numbers = #tpu.dot_dimension_numbers<[1], [0], [0], [1], [0, 0, 1, 1], [], []>} : vector<2x32xf32>, vector<32x32xf32>, vector<2x32xf32> -> vector<2x32xf32>
    %c4 = arith.constant 4 : index
    %c0_70 = arith.constant 0 : index
    %c0_71 = arith.constant 0 : index
    %109 = vector.load %arg9[%c4, %c0_70, %c0_71] : memref<6x32x32xf32, #tpu.memory_space<vmem>>, vector<1x32x32xf32>
    %110 = vector.shape_cast %109 : vector<1x32x32xf32> to vector<32x32xf32>
    %cst_72 = arith.constant dense<0.000000e+00> : vector<2x32xf32>
    %111 = tpu.matmul %100, %110, %cst_72 {dimension_numbers = #tpu.dot_dimension_numbers<[1], [0], [0], [1], [0, 0, 1, 1], [], []>} : vector<2x32xf32>, vector<32x32xf32>, vector<2x32xf32> -> vector<2x32xf32>
    %c5 = arith.constant 5 : index
    %c0_73 = arith.constant 0 : index
    %c0_74 = arith.constant 0 : index
    %112 = vector.load %arg9[%c5, %c0_73, %c0_74] : memref<6x32x32xf32, #tpu.memory_space<vmem>>, vector<1x32x32xf32>
    %113 = vector.shape_cast %112 : vector<1x32x32xf32> to vector<32x32xf32>
    %cst_75 = arith.constant dense<0.000000e+00> : vector<2x32xf32>
    %114 = tpu.matmul %100, %113, %cst_75 {dimension_numbers = #tpu.dot_dimension_numbers<[1], [0], [0], [1], [0, 0, 1, 1], [], []>} : vector<2x32xf32>, vector<32x32xf32>, vector<2x32xf32> -> vector<2x32xf32>
    %c3_76 = arith.constant 3 : index
    %c0_77 = arith.constant 0 : index
    %c0_78 = arith.constant 0 : index
    %115 = vector.load %arg10[%c3_76, %c0_77, %c0_78] : memref<6x32x32xf32, #tpu.memory_space<vmem>>, vector<1x32x32xf32>
    %116 = vector.shape_cast %115 : vector<1x32x32xf32> to vector<32x32xf32>
    %cst_79 = arith.constant dense<0.000000e+00> : vector<2x32xf32>
    %117 = tpu.matmul %105, %116, %cst_79 {dimension_numbers = #tpu.dot_dimension_numbers<[1], [0], [0], [1], [0, 0, 1, 1], [], []>} : vector<2x32xf32>, vector<32x32xf32>, vector<2x32xf32> -> vector<2x32xf32>
    %c4_80 = arith.constant 4 : index
    %c0_81 = arith.constant 0 : index
    %c0_82 = arith.constant 0 : index
    %118 = vector.load %arg10[%c4_80, %c0_81, %c0_82] : memref<6x32x32xf32, #tpu.memory_space<vmem>>, vector<1x32x32xf32>
    %119 = vector.shape_cast %118 : vector<1x32x32xf32> to vector<32x32xf32>
    %cst_83 = arith.constant dense<0.000000e+00> : vector<2x32xf32>
    %120 = tpu.matmul %105, %119, %cst_83 {dimension_numbers = #tpu.dot_dimension_numbers<[1], [0], [0], [1], [0, 0, 1, 1], [], []>} : vector<2x32xf32>, vector<32x32xf32>, vector<2x32xf32> -> vector<2x32xf32>
    %c5_84 = arith.constant 5 : index
    %c0_85 = arith.constant 0 : index
    %c0_86 = arith.constant 0 : index
    %121 = vector.load %arg10[%c5_84, %c0_85, %c0_86] : memref<6x32x32xf32, #tpu.memory_space<vmem>>, vector<1x32x32xf32>
    %122 = vector.shape_cast %121 : vector<1x32x32xf32> to vector<32x32xf32>
    %cst_87 = arith.constant dense<0.000000e+00> : vector<2x32xf32>
    %123 = tpu.matmul %105, %122, %cst_87 {dimension_numbers = #tpu.dot_dimension_numbers<[1], [0], [0], [1], [0, 0, 1, 1], [], []>} : vector<2x32xf32>, vector<32x32xf32>, vector<2x32xf32> -> vector<2x32xf32>
    %124 = arith.addf %108, %117 : vector<2x32xf32>
    %c2_88 = arith.constant 2 : index
    %c0_89 = arith.constant 0 : index
    %c0_90 = arith.constant 0 : index
    %125 = vector.load %arg11[%c2_88, %c0_89, %c0_90] : memref<4x1x32xf32, #tpu.memory_space<vmem>>, vector<1x1x32xf32>
    %126 = vector.shape_cast %125 : vector<1x1x32xf32> to vector<1x32xf32>
    %127 = vector.broadcast %126 : vector<1x32xf32> to vector<2x32xf32>
    %128 = arith.addf %124, %127 : vector<2x32xf32>
    %129 = arith.negf %128 : vector<2x32xf32>
    %130 = math.exp %129 : vector<2x32xf32>
    %cst_91 = arith.constant 1.000000e+00 : f32
    %131 = vector.broadcast %cst_91 : f32 to vector<2x32xf32>
    %132 = arith.addf %131, %130 : vector<2x32xf32>
    %133 = arith.divf %131, %132 : vector<2x32xf32>
    %134 = arith.addf %111, %120 : vector<2x32xf32>
    %c3_92 = arith.constant 3 : index
    %c0_93 = arith.constant 0 : index
    %c0_94 = arith.constant 0 : index
    %135 = vector.load %arg11[%c3_92, %c0_93, %c0_94] : memref<4x1x32xf32, #tpu.memory_space<vmem>>, vector<1x1x32xf32>
    %136 = vector.shape_cast %135 : vector<1x1x32xf32> to vector<1x32xf32>
    %137 = vector.broadcast %136 : vector<1x32xf32> to vector<2x32xf32>
    %138 = arith.addf %134, %137 : vector<2x32xf32>
    %139 = arith.negf %138 : vector<2x32xf32>
    %140 = math.exp %139 : vector<2x32xf32>
    %cst_95 = arith.constant 1.000000e+00 : f32
    %141 = vector.broadcast %cst_95 : f32 to vector<2x32xf32>
    %142 = arith.addf %141, %140 : vector<2x32xf32>
    %143 = arith.divf %141, %142 : vector<2x32xf32>
    %c1_96 = arith.constant 1 : index
    %c0_97 = arith.constant 0 : index
    %c0_98 = arith.constant 0 : index
    %144 = vector.load %arg12[%c1_96, %c0_97, %c0_98] : memref<2x1x32xf32, #tpu.memory_space<vmem>>, vector<1x1x32xf32>
    %145 = vector.shape_cast %144 : vector<1x1x32xf32> to vector<1x32xf32>
    %146 = vector.broadcast %145 : vector<1x32xf32> to vector<2x32xf32>
    %147 = arith.addf %114, %146 : vector<2x32xf32>
    %c1_99 = arith.constant 1 : index
    %c0_100 = arith.constant 0 : index
    %c0_101 = arith.constant 0 : index
    %148 = vector.load %arg13[%c1_99, %c0_100, %c0_101] : memref<2x1x32xf32, #tpu.memory_space<vmem>>, vector<1x1x32xf32>
    %149 = vector.shape_cast %148 : vector<1x1x32xf32> to vector<1x32xf32>
    %150 = vector.broadcast %149 : vector<1x32xf32> to vector<2x32xf32>
    %151 = arith.addf %123, %150 : vector<2x32xf32>
    %152 = arith.mulf %133, %151 : vector<2x32xf32>
    %153 = arith.addf %147, %152 : vector<2x32xf32>
    %154 = math.tanh %153 : vector<2x32xf32>
    %cst_102 = arith.constant 1.000000e+00 : f32
    %155 = vector.broadcast %cst_102 : f32 to vector<2x32xf32>
    %156 = arith.subf %155, %143 : vector<2x32xf32>
    %157 = arith.mulf %156, %154 : vector<2x32xf32>
    %158 = arith.mulf %143, %105 : vector<2x32xf32>
    %159 = arith.addf %157, %158 : vector<2x32xf32>
    %c1_103 = arith.constant 1 : index
    %c0_104 = arith.constant 0 : index
    %c0_105 = arith.constant 0 : index
    %160 = vector.load %arg22[%c1_103, %c0_104, %c0_105] : memref<2x2x32xf32, #tpu.memory_space<vmem>>, vector<1x2x32xf32>
    %161 = vector.shape_cast %160 : vector<1x2x32xf32> to vector<2x32xf32>
    %162 = vector.shape_cast %159 : vector<2x32xf32> to vector<1x2x32xf32>
    tpu.vector_store %arg22[%c1_103, %c0_104, %c0_105], %162 {strides = array<i32>} : memref<2x2x32xf32, #tpu.memory_space<vmem>>, vector<1x2x32xf32>,
    %c0_106 = arith.constant 0 : index
    %c0_107 = arith.constant 0 : index
    %163 = vector.load %arg14[%c0_106, %c0_107] : memref<32x32xf32, #tpu.memory_space<vmem>>, vector<32x32xf32>
    %cst_108 = arith.constant dense<0.000000e+00> : vector<2x32xf32>
    %164 = tpu.matmul %159, %163, %cst_108 {dimension_numbers = #tpu.dot_dimension_numbers<[1], [0], [0], [1], [0, 0, 1, 1], [], []>} : vector<2x32xf32>, vector<32x32xf32>, vector<2x32xf32> -> vector<2x32xf32>
    %c0_109 = arith.constant 0 : index
    %c0_110 = arith.constant 0 : index
    %165 = vector.load %arg15[%c0_109, %c0_110] : memref<1x32xf32, #tpu.memory_space<vmem>>, vector<1x32xf32>
    %166 = vector.broadcast %165 : vector<1x32xf32> to vector<2x32xf32>
    %167 = arith.addf %164, %166 : vector<2x32xf32>
    %c0_111 = arith.constant 0 : index
    %c0_112 = arith.constant 0 : index
    %168 = vector.load %arg16[%c0_111, %c0_112] : memref<1x32xf32, #tpu.memory_space<vmem>>, vector<1x32xf32>
    %c0_113 = arith.constant 0 : index
    %c0_114 = arith.constant 0 : index
    %169 = vector.load %arg17[%c0_113, %c0_114] : memref<1x32xf32, #tpu.memory_space<vmem>>, vector<1x32xf32>
    %cst_115 = arith.constant dense<0.000000e+00> : vector<2xf32>
    %170 = vector.multi_reduction <add>, %167, %cst_115 [1] : vector<2x32xf32> to vector<2xf32>
    %171 = vector.shape_cast %170 : vector<2xf32> to vector<2x1xf32>
    %cst_116 = arith.constant 3.200000e+01 : f32
    %172 = vector.broadcast %cst_116 : f32 to vector<2x1xf32>
    %173 = arith.divf %171, %172 : vector<2x1xf32>
    %174 = vector.broadcast %173 : vector<2x1xf32> to vector<2x32xf32>
    %175 = arith.subf %167, %174 : vector<2x32xf32>
    %176 = vector.broadcast %173 : vector<2x1xf32> to vector<2x32xf32>
    %177 = arith.subf %167, %176 : vector<2x32xf32>
    %178 = arith.mulf %175, %177 : vector<2x32xf32>
    %cst_117 = arith.constant dense<0.000000e+00> : vector<2xf32>
    %179 = vector.multi_reduction <add>, %178, %cst_117 [1] : vector<2x32xf32> to vector<2xf32>
    %180 = vector.shape_cast %179 : vector<2xf32> to vector<2x1xf32>
    %cst_118 = arith.constant 3.200000e+01 : f32
    %181 = vector.broadcast %cst_118 : f32 to vector<2x1xf32>
    %182 = arith.divf %180, %181 : vector<2x1xf32>
    %183 = vector.broadcast %173 : vector<2x1xf32> to vector<2x32xf32>
    %184 = arith.subf %167, %183 : vector<2x32xf32>
    %cst_119 = arith.constant 9.99999974E-6 : f32
    %185 = vector.broadcast %cst_119 : f32 to vector<2x1xf32>
    %186 = arith.addf %182, %185 : vector<2x1xf32>
    %187 = math.rsqrt %186 : vector<2x1xf32>
    %188 = vector.broadcast %187 : vector<2x1xf32> to vector<2x32xf32>
    %189 = arith.mulf %184, %188 : vector<2x32xf32>
    %190 = vector.broadcast %168 : vector<1x32xf32> to vector<2x32xf32>
    %191 = arith.mulf %189, %190 : vector<2x32xf32>
    %192 = vector.broadcast %169 : vector<1x32xf32> to vector<2x32xf32>
    %193 = arith.addf %191, %192 : vector<2x32xf32>
    %cst_120 = arith.constant 0.000000e+00 : f32
    %194 = vector.broadcast %cst_120 : f32 to vector<2x32xf32>
    %195 = arith.cmpf ogt, %193, %194 : vector<2x32xf32>
    %cst_121 = arith.constant 2.000000e-01 : f32
    %196 = vector.broadcast %cst_121 : f32 to vector<2x32xf32>
    %197 = arith.mulf %196, %193 : vector<2x32xf32>
    %198 = arith.select %195, %193, %197 : vector<2x32xi1>, vector<2x32xf32>
    %c0_122 = arith.constant 0 : index
    %c0_123 = arith.constant 0 : index
    %199 = vector.load %arg18[%c0_122, %c0_123] : memref<32x128xf32, #tpu.memory_space<vmem>>, vector<32x128xf32>
    %cst_124 = arith.constant dense<0.000000e+00> : vector<2x128xf32>
    %200 = tpu.matmul %198, %199, %cst_124 {dimension_numbers = #tpu.dot_dimension_numbers<[1], [0], [0], [1], [0, 0, 1, 1], [], []>} : vector<2x32xf32>, vector<32x128xf32>, vector<2x128xf32> -> vector<2x128xf32>
    %c0_125 = arith.constant 0 : index
    %c0_126 = arith.constant 0 : index
    %201 = vector.load %arg19[%c0_125, %c0_126] : memref<1x128xf32, #tpu.memory_space<vmem>>, vector<1x128xf32>
    %202 = vector.broadcast %201 : vector<1x128xf32> to vector<2x128xf32>
    %203 = arith.addf %200, %202 : vector<2x128xf32>
    %c0_127 = arith.constant 0 : index
    %c0_128 = arith.constant 0 : index
    %c0_129 = arith.constant 0 : index
    %204 = vector.load %arg20[%c0_127, %c0_128, %c0_129] : memref<1x2x128xf32, #tpu.memory_space<vmem>>, vector<1x2x128xf32>
    %205 = vector.shape_cast %204 : vector<1x2x128xf32> to vector<2x128xf32>
    %206 = vector.shape_cast %203 : vector<2x128xf32> to vector<1x2x128xf32>
    tpu.vector_store %arg20[%c0_127, %c0_128, %c0_129], %206 {strides = array<i32>} : memref<1x2x128xf32, #tpu.memory_space<vmem>>, vector<1x2x128xf32>,
    %c0_i32_130 = arith.constant 0 : i32
    %207 = arith.cmpi eq, %arg0, %c0_i32_130 : i32
    %208 = arith.extui %207 : i1 to i32
    %c0_i32_131 = arith.constant 0 : i32
    %209 = arith.cmpi ne, %208, %c0_i32_131 : i32
    scf.if %209 {
      %c0_132 = arith.constant 0 : index
      %c0_133 = arith.constant 0 : index
      %c0_134 = arith.constant 0 : index
      %210 = vector.load %arg22[%c0_132, %c0_133, %c0_134] : memref<2x2x32xf32, #tpu.memory_space<vmem>>, vector<2x2x32xf32>
      %c0_135 = arith.constant 0 : index
      %c0_136 = arith.constant 0 : index
      %c0_137 = arith.constant 0 : index
      %211 = vector.load %arg21[%c0_135, %c0_136, %c0_137] : memref<2x2x32xf32, #tpu.memory_space<vmem>>, vector<2x2x32xf32>
      tpu.vector_store %arg21[%c0_135, %c0_136, %c0_137], %210 {strides = array<i32>} : memref<2x2x32xf32, #tpu.memory_space<vmem>>, vector<2x2x32xf32>,
    } else {
    }
    return
  }
  func.func @transform_0(%arg0: i32, %arg1: memref<1xi32, #tpu.memory_space<smem>>) -> (i32, i32, i32) {
    %c0_i32 = arith.constant 0 : i32
    %c0_i32_0 = arith.constant 0 : i32
    %c0_i32_1 = arith.constant 0 : i32
    return %arg0, %c0_i32, %c0_i32_0 : i32, i32, i32
  }
  func.func @transform_1(%arg0: i32, %arg1: memref<1xi32, #tpu.memory_space<smem>>) -> (i32, i32, i32) {
    %0 = arith.index_cast %arg0 : i32 to index
    %1 = memref.load %arg1[%0] : memref<1xi32, #tpu.memory_space<smem>>
    %c0_i32 = arith.constant 0 : i32
    %c0_i32_0 = arith.constant 0 : i32
    %c0_i32_1 = arith.constant 0 : i32
    return %1, %c0_i32, %c0_i32_0 : i32, i32, i32
  }
  func.func @transform_2(%arg0: i32, %arg1: memref<1xi32, #tpu.memory_space<smem>>) -> (i32, i32, i32) {
    %c0_i32 = arith.constant 0 : i32
    %c0_i32_0 = arith.constant 0 : i32
    %c0_i32_1 = arith.constant 0 : i32
    %c0_i32_2 = arith.constant 0 : i32
    return %c0_i32, %c0_i32_0, %c0_i32_1 : i32, i32, i32
  }
  func.func @transform_3(%arg0: i32, %arg1: memref<1xi32, #tpu.memory_space<smem>>) -> (i32, i32) {
    %c0_i32 = arith.constant 0 : i32
    %c0_i32_0 = arith.constant 0 : i32
    %c0_i32_1 = arith.constant 0 : i32
    return %c0_i32, %c0_i32_0 : i32, i32
  }
  func.func @transform_4(%arg0: i32, %arg1: memref<1xi32, #tpu.memory_space<smem>>) -> (i32, i32) {
    %c0_i32 = arith.constant 0 : i32
    %c0_i32_0 = arith.constant 0 : i32
    %c0_i32_1 = arith.constant 0 : i32
    return %c0_i32, %c0_i32_0 : i32, i32
  }
  func.func @transform_5(%arg0: i32, %arg1: memref<1xi32, #tpu.memory_space<smem>>) -> (i32, i32) {
    %c0_i32 = arith.constant 0 : i32
    %c0_i32_0 = arith.constant 0 : i32
    %c0_i32_1 = arith.constant 0 : i32
    return %c0_i32, %c0_i32_0 : i32, i32
  }
  func.func @transform_6(%arg0: i32, %arg1: memref<1xi32, #tpu.memory_space<smem>>) -> (i32, i32) {
    %c0_i32 = arith.constant 0 : i32
    %c0_i32_0 = arith.constant 0 : i32
    %c0_i32_1 = arith.constant 0 : i32
    return %c0_i32, %c0_i32_0 : i32, i32
  }
  func.func @transform_7(%arg0: i32, %arg1: memref<1xi32, #tpu.memory_space<smem>>) -> (i32, i32, i32) {
    %c0_i32 = arith.constant 0 : i32
    %c0_i32_0 = arith.constant 0 : i32
    %c0_i32_1 = arith.constant 0 : i32
    %c0_i32_2 = arith.constant 0 : i32
    return %c0_i32, %c0_i32_0, %c0_i32_1 : i32, i32, i32
  }
  func.func @transform_8(%arg0: i32, %arg1: memref<1xi32, #tpu.memory_space<smem>>) -> (i32, i32, i32) {
    %c0_i32 = arith.constant 0 : i32
    %c0_i32_0 = arith.constant 0 : i32
    %c0_i32_1 = arith.constant 0 : i32
    %c0_i32_2 = arith.constant 0 : i32
    return %c0_i32, %c0_i32_0, %c0_i32_1 : i32, i32, i32
  }
  func.func @transform_9(%arg0: i32, %arg1: memref<1xi32, #tpu.memory_space<smem>>) -> (i32, i32, i32) {
    %c0_i32 = arith.constant 0 : i32
    %c0_i32_0 = arith.constant 0 : i32
    %c0_i32_1 = arith.constant 0 : i32
    %c0_i32_2 = arith.constant 0 : i32
    return %c0_i32, %c0_i32_0, %c0_i32_1 : i32, i32, i32
  }
  func.func @transform_10(%arg0: i32, %arg1: memref<1xi32, #tpu.memory_space<smem>>) -> (i32, i32, i32) {
    %c0_i32 = arith.constant 0 : i32
    %c0_i32_0 = arith.constant 0 : i32
    %c0_i32_1 = arith.constant 0 : i32
    %c0_i32_2 = arith.constant 0 : i32
    return %c0_i32, %c0_i32_0, %c0_i32_1 : i32, i32, i32
  }
  func.func @transform_11(%arg0: i32, %arg1: memref<1xi32, #tpu.memory_space<smem>>) -> (i32, i32, i32) {
    %c0_i32 = arith.constant 0 : i32
    %c0_i32_0 = arith.constant 0 : i32
    %c0_i32_1 = arith.constant 0 : i32
    %c0_i32_2 = arith.constant 0 : i32
    return %c0_i32, %c0_i32_0, %c0_i32_1 : i32, i32, i32
  }
  func.func @transform_12(%arg0: i32, %arg1: memref<1xi32, #tpu.memory_space<smem>>) -> (i32, i32) {
    %c0_i32 = arith.constant 0 : i32
    %c0_i32_0 = arith.constant 0 : i32
    %c0_i32_1 = arith.constant 0 : i32
    return %c0_i32, %c0_i32_0 : i32, i32
  }
  func.func @transform_13(%arg0: i32, %arg1: memref<1xi32, #tpu.memory_space<smem>>) -> (i32, i32) {
    %c0_i32 = arith.constant 0 : i32
    %c0_i32_0 = arith.constant 0 : i32
    %c0_i32_1 = arith.constant 0 : i32
    return %c0_i32, %c0_i32_0 : i32, i32
  }
  func.func @transform_14(%arg0: i32, %arg1: memref<1xi32, #tpu.memory_space<smem>>) -> (i32, i32) {
    %c0_i32 = arith.constant 0 : i32
    %c0_i32_0 = arith.constant 0 : i32
    %c0_i32_1 = arith.constant 0 : i32
    return %c0_i32, %c0_i32_0 : i32, i32
  }
  func.func @transform_15(%arg0: i32, %arg1: memref<1xi32, #tpu.memory_space<smem>>) -> (i32, i32) {
    %c0_i32 = arith.constant 0 : i32
    %c0_i32_0 = arith.constant 0 : i32
    %c0_i32_1 = arith.constant 0 : i32
    return %c0_i32, %c0_i32_0 : i32, i32
  }
  func.func @transform_16(%arg0: i32, %arg1: memref<1xi32, #tpu.memory_space<smem>>) -> (i32, i32) {
    %c0_i32 = arith.constant 0 : i32
    %c0_i32_0 = arith.constant 0 : i32
    %c0_i32_1 = arith.constant 0 : i32
    return %c0_i32, %c0_i32_0 : i32, i32
  }
  func.func @transform_17(%arg0: i32, %arg1: memref<1xi32, #tpu.memory_space<smem>>) -> (i32, i32) {
    %c0_i32 = arith.constant 0 : i32
    %c0_i32_0 = arith.constant 0 : i32
    %c0_i32_1 = arith.constant 0 : i32
    return %c0_i32, %c0_i32_0 : i32, i32
  }
  func.func @transform_18(%arg0: i32, %arg1: memref<1xi32, #tpu.memory_space<smem>>) -> (i32, i32, i32) {
    %c0_i32 = arith.constant 0 : i32
    %c0_i32_0 = arith.constant 0 : i32
    %c0_i32_1 = arith.constant 0 : i32
    return %arg0, %c0_i32, %c0_i32_0 : i32, i32, i32
  }
  func.func @transform_19(%arg0: i32, %arg1: memref<1xi32, #tpu.memory_space<smem>>) -> (i32, i32, i32) {
    %c0_i32 = arith.constant 0 : i32
    %c0_i32_0 = arith.constant 0 : i32
    %c0_i32_1 = arith.constant 0 : i32
    %c0_i32_2 = arith.constant 0 : i32
    return %c0_i32, %c0_i32_0, %c0_i32_1 : i32, i32, i32
  }
}

</mosaic_0001>

<bundles_post_ra>
// kernel: tpu_custom_call.1
= control target key start
LH: loop header
LB: loop body
LE: loop exit
PB: predicated region body
PF: predicated region fallthrough
CT: control target
= control target key end

     0   :  { %s2937_s0 = inlined_call_operand.<no memory space> [shape: s32[1], index: 0, kind: input, shape index: {}]   ;;  %s2938_s1 = inlined_call_operand.hbm [shape: f32[1,2,16], index: 1, kind: input, shape index: {}]   ;;  %s2939_s2 = inlined_call_operand.vmem [shape: f32[300,1,32], index: 2, kind: input, shape index: {}]   ;;  %s2940_s3 = inlined_call_operand.hbm [shape: f32[2,2,32], index: 3, kind: input, shape index: {}]   ;;  %s2941_s4 = inlined_call_operand.hbm [shape: f32[16,32], index: 4, kind: input, shape index: {}]   ;;  %s2942_s5 = inlined_call_operand.hbm [shape: f32[1,32], index: 5, kind: input, shape index: {}]   ;;  %s2943_s6 = inlined_call_operand.hbm [shape: f32[1,32], index: 6, kind: input, shape index: {}]   ;;  %s2944_s7 = inlined_call_operand.hbm [shape: f32[1,32], index: 7, kind: input, shape index: {}]   ;;  %s2945_s8 = inlined_call_operand.vmem [shape: f32[6,32,32], index: 8, kind: input, shape index: {}]   ;;  %s2946_s9 = inlined_call_operand.vmem [shape: f32[6,32,32], index: 9, kind: input, shape index: {}]   ;;  %s2947_s10 = inlined_call_operand.hbm [shape: f32[4,1,32], index: 10, kind: input, shape index: {}]   ;;  %s2948_s11 = inlined_call_operand.hbm [shape: f32[2,1,32], index: 11, kind: input, shape index: {}]   ;;  %s2949_s12 = inlined_call_operand.hbm [shape: f32[2,1,32], index: 12, kind: input, shape index: {}]   ;;  %s2950_s13 = inlined_call_operand.vmem [shape: f32[32,32], index: 13, kind: input, shape index: {}]   ;;  %s2951_s14 = inlined_call_operand.hbm [shape: f32[1,32], index: 14, kind: input, shape index: {}]   ;;  %s2952_s15 = inlined_call_operand.hbm [shape: f32[1,32], index: 15, kind: input, shape index: {}]   ;;  %s2953_s16 = inlined_call_operand.vmem [shape: f32[1,32], index: 16, kind: input, shape index: {}]   ;;  %s2954_s17 = inlined_call_operand.vmem [shape: f32[32,128], index: 17, kind: input, shape index: {}]   ;;  %s2955_s18 = inlined_call_operand.vmem [shape: f32[1,128], index: 18, kind: input, shape index: {}]   ;;  %s2956_s19 = inlined_call_operand.hbm [shape: f32[1,2,128], index: 19, kind: output, shape index: {0}]   ;;  %s2957_s20 = inlined_call_operand.hbm [shape: f32[2,2,32], index: 20, kind: output, shape index: {1}]  }
   0x1   :  { %2963 = sst [smem:[#allocation34_spill]] %s2937_s0 }
   0x2   :  { %2964 = sst [smem:[#allocation35_spill]] %s2938_s1 }
   0x3   :  { %2965 = sst [smem:[#allocation36_spill]] %s2939_s2 }
   0x4   :  { %2966 = sst [smem:[#allocation37_spill]] %s2940_s3 }
   0x5   :  { %2967 = sst [smem:[#allocation38_spill]] %s2941_s4 }
   0x6   :  { %2968 = sst [smem:[#allocation39_spill]] %s2955_s18 }
   0x7   :  { %2969 = sst [smem:[#allocation40_spill]] %s2956_s19 }
   0x8   :  { %27 = vsyncpa [#allocation6], 0 }
   0x9   :  { %28 = vsyncpa [#allocation9], 0 }
   0xa   :  { %29 = vsyncpa [#allocation12], 0 }
   0xb   :  { %30 = vsyncpa [#allocation15], 0 }
   0xc   :  { %31 = vsyncpa [#allocation18], 0 }
   0xd   :  { %32 = vsyncpa [#allocation21], 0 }
   0xe   :  { %33 = vsyncpa [#allocation7], 0 }
   0xf   :  { %34 = vsyncpa [#allocation25], 0  ;;  %s2361_s1 = smov [#allocation8]   ;;  %s2970_s2 = sld [smem:[#allocation37_spill]] }
  0x10   :  { %s57_s22 = sshll.u32 %s2361_s1, 4  ;;  %s58_s22 = int_to_ptr.vmem [resolvable:$true] %s57_s22 }
  0x15   :  { %s2059_s25 = scalar_lea.hbm %s2970_s2, 64 }
  0x16   :  { %p2060_p0 = scmp.ne.s32.totalorder %s2970_s2, %s2059_s25  ;;  %p2063_p1 = scmp.lt.u32.totalorder %s2059_s25, %s2970_s2 }
  0x18   :  { %p2065_p2 = pnand %p2063_p1, %p2060_p0 }
  0x1a   :  { %2068 = shalt.err (!%p2065_p2)
}
  0x1b   :  { %s2069_s4 = scalar_lea.vmem %s58_s22, 64  ;;  %p2074_p4 = scmp.lt.s32.totalorder %s58_s22, %s58_s22 }
  0x1c   :  { %p2070_p3 = scmp.ne.s32.totalorder %s58_s22, %s2069_s4  ;;  %p2075_p5 = scmp.lt.s32.totalorder %s2069_s4, %s2069_s4 }
  0x1e   :  { %p2076_p6 = por %p2075_p5, %p2074_p4 }
  0x20   :  { %p2077_p7 = pnand %p2076_p6, %p2070_p3 }
  0x22   :  { %2080 = shalt.err (!%p2077_p7)
}
  0x23   :  { %s2362_s29 = smov 32   ;;  %s2363_s30 = smov 2  }
  0x24   :  { %63 = dma.hbm_to_vmem [thread:$0]  %s2970_s2, 64, %s58_s22, [#allocation9], %s2362_s29, %s2362_s29, %s2363_s30  }
  0x25   :  { %s2364_s1 = smov [#allocation11]   ;;  %s2365_s24 = smov [#allocation14]  }
  0x26   :  { %s82_s23 = sshll.u32 %s2364_s1, 4  ;;  %s102_s25 = sshll.u32 %s2365_s24, 4  ;;  %s83_s23 = int_to_ptr.vmem [resolvable:$true] %s82_s23  ;;  %s103_s25 = int_to_ptr.vmem [resolvable:$true] %s102_s25 }
  0x27   :  { %s2081_s27 = scalar_lea.hbm %s2942_s5, 16 }
  0x28   :  { %p2082_p8 = scmp.ne.s32.totalorder %s2942_s5, %s2081_s27  ;;  %p2085_p9 = scmp.lt.u32.totalorder %s2081_s27, %s2942_s5 }
  0x2a   :  { %p2087_p10 = pnand %p2085_p9, %p2082_p8 }
  0x2c   :  { %2090 = shalt.err (!%p2087_p10)
}
  0x2d   :  { %s2091_s22 = scalar_lea.vmem %s83_s23, 16  ;;  %s2095_s2 = scalar_lea.vmem %s83_s23, 32 }
  0x2e   :  { %p2092_p11 = scmp.ne.s32.totalorder %s83_s23, %s2091_s22  ;;  %p2096_p12 = scmp.lt.s32.totalorder %s83_s23, %s83_s23 }
  0x2f   :  { %p2097_p13 = scmp.lt.s32.totalorder %s2095_s2, %s2091_s22 }
  0x31   :  { %p2098_p0 = por %p2097_p13, %p2096_p12 }
  0x33   :  { %p2099_p1 = pnand %p2098_p0, %p2092_p11 }
  0x35   :  { %2102 = shalt.err (!%p2099_p1)
}
  0x36   :  { %85 = dma.hbm_to_vmem [thread:$0]  %s2942_s5, 16, %s83_s23, [#allocation12]  }
  0x37   :  { %s2103_s18 = scalar_lea.hbm %s2944_s7, 16 }
  0x38   :  { %p2104_p2 = scmp.ne.s32.totalorder %s2944_s7, %s2103_s18  ;;  %p2107_p3 = scmp.lt.u32.totalorder %s2103_s18, %s2944_s7 }
  0x3a   :  { %p2109_p4 = pnand %p2107_p3, %p2104_p2 }
  0x3c   :  { %2112 = shalt.err (!%p2109_p4)
}
  0x3d   :  { %s2113_s28 = scalar_lea.vmem %s103_s25, 16  ;;  %s2117_s4 = scalar_lea.vmem %s103_s25, 32 }
  0x3e   :  { %p2114_p5 = scmp.ne.s32.totalorder %s103_s25, %s2113_s28  ;;  %p2118_p6 = scmp.lt.s32.totalorder %s103_s25, %s103_s25 }
  0x3f   :  { %p2119_p7 = scmp.lt.s32.totalorder %s2117_s4, %s2113_s28 }
  0x41   :  { %p2120_p8 = por %p2119_p7, %p2118_p6 }
  0x43   :  { %p2121_p9 = pnand %p2120_p8, %p2114_p5 }
  0x45   :  { %2124 = shalt.err (!%p2121_p9)
}
  0x46   :  { %105 = dma.hbm_to_vmem [thread:$0]  %s2944_s7, 16, %s103_s25, [#allocation15]  }
  0x47   :  { %s2366_s22 = smov [#allocation17]   ;;  %s2367_s0 = smov [#allocation20]  }
  0x48   :  { %s127_s2 = sshll.u32 %s2366_s22, 4  ;;  %s154_s21 = sshll.u32 %s2367_s0, 4  ;;  %s128_s2 = int_to_ptr.vmem [resolvable:$true] %s127_s2  ;;  %s155_s21 = int_to_ptr.vmem [resolvable:$true] %s154_s21 }
  0x49   :  { %s2125_s18 = scalar_lea.hbm %s2948_s11, 32 }
  0x4a   :  { %p2126_p10 = scmp.ne.s32.totalorder %s2948_s11, %s2125_s18  ;;  %p2129_p11 = scmp.lt.u32.totalorder %s2125_s18, %s2948_s11 }
  0x4c   :  { %p2131_p12 = pnand %p2129_p11, %p2126_p10 }
  0x4e   :  { %2134 = shalt.err (!%p2131_p12)
}
  0x4f   :  { %s2135_s7 = scalar_lea.vmem %s128_s2, 32  ;;  %p2140_p0 = scmp.lt.s32.totalorder %s128_s2, %s128_s2 }
  0x50   :  { %p2136_p13 = scmp.ne.s32.totalorder %s128_s2, %s2135_s7  ;;  %p2141_p1 = scmp.lt.s32.totalorder %s2135_s7, %s2135_s7 }
  0x52   :  { %p2142_p2 = por %p2141_p1, %p2140_p0 }
  0x54   :  { %p2143_p3 = pnand %p2142_p2, %p2136_p13 }
  0x56   :  { %2146 = shalt.err (!%p2143_p3)
}
  0x57   :  { %s2368_s25 = smov 16   ;;  %s2369_s28 = smov 1  }
  0x58   :  { %133 = dma.hbm_to_vmem [thread:$0]  %s2948_s11, 32, %s128_s2, [#allocation18], %s2368_s25, %s2368_s25, %s2369_s28  }
  0x59   :  { %s2147_s0 = scalar_lea.hbm %s2951_s14, 16 }
  0x5a   :  { %p2148_p4 = scmp.ne.s32.totalorder %s2951_s14, %s2147_s0  ;;  %p2151_p5 = scmp.lt.u32.totalorder %s2147_s0, %s2951_s14 }
  0x5c   :  { %p2153_p6 = pnand %p2151_p5, %p2148_p4 }
  0x5e   :  { %2156 = shalt.err (!%p2153_p6)
}
  0x5f   :  { %s2157_s3 = scalar_lea.vmem %s155_s21, 16  ;;  %s2161_s26 = scalar_lea.vmem %s155_s21, 32 }
  0x60   :  { %p2158_p7 = scmp.ne.s32.totalorder %s155_s21, %s2157_s3  ;;  %p2162_p8 = scmp.lt.s32.totalorder %s155_s21, %s155_s21 }
  0x61   :  { %p2163_p9 = scmp.lt.s32.totalorder %s2161_s26, %s2157_s3 }
  0x63   :  { %p2164_p10 = por %p2163_p9, %p2162_p8 }
  0x65   :  { %p2165_p11 = pnand %p2164_p10, %p2158_p7 }
  0x67   :  { %2168 = shalt.err (!%p2165_p11)
}
  0x68   :  { %157 = dma.hbm_to_vmem [thread:$0]  %s2951_s14, 16, %s155_s21, [#allocation21]  }
  0x69   :  { %s2370_s27 = smov [#allocation5]   ;;  %s2371_s4 = smov [#allocation10]  }
  0x6a   :  { %s41_s7 = sshll.u32 %s2370_s27, 4  ;;  %s69_s5 = sshll.u32 %s2371_s4, 4  ;;  %s42_s7 = int_to_ptr.vmem [resolvable:$true] %s41_s7  ;;  %s70_s5 = int_to_ptr.vmem [resolvable:$true] %s69_s5 }
  0x6b   :  { %s2971_s0 = sld [smem:[#allocation35_spill]] }
  0x71   :  { %s2169_s1 = scalar_lea.hbm %s2971_s0, 32 }
  0x72   :  { %p2170_p12 = scmp.ne.s32.totalorder %s2971_s0, %s2169_s1  ;;  %p2173_p13 = scmp.lt.u32.totalorder %s2169_s1, %s2971_s0 }
  0x74   :  { %p2175_p0 = pnand %p2173_p13, %p2170_p12 }
  0x76   :  { %2178 = shalt.err (!%p2175_p0)
}
  0x77   :  { %s2179_s14 = scalar_lea.vmem %s42_s7, 32  ;;  %p2184_p2 = scmp.lt.s32.totalorder %s42_s7, %s42_s7 }
  0x78   :  { %p2180_p1 = scmp.ne.s32.totalorder %s42_s7, %s2179_s14  ;;  %p2185_p3 = scmp.lt.s32.totalorder %s2179_s14, %s2179_s14 }
  0x7a   :  { %p2186_p4 = por %p2185_p3, %p2184_p2 }
  0x7c   :  { %p2187_p5 = pnand %p2186_p4, %p2180_p1 }
  0x7e   :  { %2190 = shalt.err (!%p2187_p5)
}
  0x7f   :  { %44 = dma.hbm_to_vmem [thread:$0]  %s2971_s0, 32, %s42_s7, [#allocation6]  }
  0x80   :  { %s2972_s27 = sld [smem:[#allocation38_spill]] }
  0x86   :  { %s2191_s4 = scalar_lea.hbm %s2972_s27, 256 }
  0x87   :  { %p2192_p6 = scmp.ne.s32.totalorder %s2972_s27, %s2191_s4  ;;  %p2195_p7 = scmp.lt.u32.totalorder %s2191_s4, %s2972_s27 }
  0x89   :  { %p2197_p8 = pnand %p2195_p7, %p2192_p6 }
  0x8b   :  { %2200 = shalt.err (!%p2197_p8)
}
  0x8c   :  { %s2201_s18 = scalar_lea.vmem %s70_s5, 256  ;;  %p2206_p10 = scmp.lt.s32.totalorder %s70_s5, %s70_s5 }
  0x8d   :  { %p2202_p9 = scmp.ne.s32.totalorder %s70_s5, %s2201_s18  ;;  %p2207_p11 = scmp.lt.s32.totalorder %s2201_s18, %s2201_s18 }
  0x8f   :  { %p2208_p12 = por %p2207_p11, %p2206_p10 }
  0x91   :  { %p2209_p13 = pnand %p2208_p12, %p2202_p9 }
  0x93   :  { %2212 = shalt.err (!%p2209_p13)
}
  0x94   :  { %s2372_s7 = smov 128   ;;  %s2373_s0 = smov 8  }
  0x95   :  { %75 = dma.hbm_to_vmem [thread:$0]  %s2972_s27, 256, %s70_s5, [#allocation9], %s2372_s7, %s2372_s7, %s2373_s0  }
  0x96   :  { %s2374_s14 = smov [#allocation13]   ;;  %s2375_s26 = smov [#allocation16]  }
  0x97   :  { %s92_s21 = sshll.u32 %s2374_s14, 4  ;;  %s115_s11 = sshll.u32 %s2375_s26, 4  ;;  %s93_s21 = int_to_ptr.vmem [resolvable:$true] %s92_s21  ;;  %s116_s11 = int_to_ptr.vmem [resolvable:$true] %s115_s11 }
  0x98   :  { %s2213_s23 = scalar_lea.hbm %s2943_s6, 16 }
  0x99   :  { %p2214_p0 = scmp.ne.s32.totalorder %s2943_s6, %s2213_s23  ;;  %p2217_p1 = scmp.lt.u32.totalorder %s2213_s23, %s2943_s6 }
  0x9b   :  { %p2219_p2 = pnand %p2217_p1, %p2214_p0 }
  0x9d   :  { %2222 = shalt.err (!%p2219_p2)
}
  0x9e   :  { %s2223_s5 = scalar_lea.vmem %s93_s21, 16  ;;  %s2227_s27 = scalar_lea.vmem %s93_s21, 32 }
  0x9f   :  { %p2224_p3 = scmp.ne.s32.totalorder %s93_s21, %s2223_s5  ;;  %p2228_p4 = scmp.lt.s32.totalorder %s93_s21, %s93_s21 }
  0xa0   :  { %p2229_p5 = scmp.lt.s32.totalorder %s2227_s27, %s2223_s5 }
  0xa2   :  { %p2230_p6 = por %p2229_p5, %p2228_p4 }
  0xa4   :  { %p2231_p7 = pnand %p2230_p6, %p2224_p3 }
  0xa6   :  { %2234 = shalt.err (!%p2231_p7)
}
  0xa7   :  { %95 = dma.hbm_to_vmem [thread:$0]  %s2943_s6, 16, %s93_s21, [#allocation12]  }
  0xa8   :  { %s2235_s14 = scalar_lea.hbm %s2947_s10, 64 }
  0xa9   :  { %p2236_p8 = scmp.ne.s32.totalorder %s2947_s10, %s2235_s14  ;;  %p2239_p9 = scmp.lt.u32.totalorder %s2235_s14, %s2947_s10 }
  0xab   :  { %p2241_p10 = pnand %p2239_p9, %p2236_p8 }
  0xad   :  { %2244 = shalt.err (!%p2241_p10)
}
  0xae   :  { %s2245_s22 = scalar_lea.vmem %s116_s11, 64  ;;  %p2250_p12 = scmp.lt.s32.totalorder %s116_s11, %s116_s11 }
  0xaf   :  { %p2246_p11 = scmp.ne.s32.totalorder %s116_s11, %s2245_s22  ;;  %p2251_p13 = scmp.lt.s32.totalorder %s2245_s22, %s2245_s22 }
  0xb1   :  { %p2252_p0 = por %p2251_p13, %p2250_p12 }
  0xb3   :  { %p2253_p1 = pnand %p2252_p0, %p2246_p11 }
  0xb5   :  { %2256 = shalt.err (!%p2253_p1)
}
  0xb6   :  { %121 = dma.hbm_to_vmem [thread:$0]  %s2947_s10, 64, %s116_s11, [#allocation15], %s2368_s25, %s2368_s25, %s2369_s28  }
  0xb7   :  { %s2376_s1 = smov [#allocation19]   ;;  %s2377_s18 = smov [#allocation22]  }
  0xb8   :  { %s139_s24 = sshll.u32 %s2376_s1, 4  ;;  %s164_s5 = sshll.u32 %s2377_s18, 4  ;;  %s140_s24 = int_to_ptr.vmem [resolvable:$true] %s139_s24  ;;  %s165_s5 = int_to_ptr.vmem [resolvable:$true] %s164_s5 }
  0xb9   :  { %s2257_s0 = scalar_lea.hbm %s2949_s12, 32 }
  0xba   :  { %p2258_p2 = scmp.ne.s32.totalorder %s2949_s12, %s2257_s0  ;;  %p2261_p3 = scmp.lt.u32.totalorder %s2257_s0, %s2949_s12 }
  0xbc   :  { %p2263_p4 = pnand %p2261_p3, %p2258_p2 }
  0xbe   :  { %2266 = shalt.err (!%p2263_p4)
}
  0xbf   :  { %s2267_s10 = scalar_lea.vmem %s140_s24, 32  ;;  %p2272_p6 = scmp.lt.s32.totalorder %s140_s24, %s140_s24 }
  0xc0   :  { %p2268_p5 = scmp.ne.s32.totalorder %s140_s24, %s2267_s10  ;;  %p2273_p7 = scmp.lt.s32.totalorder %s2267_s10, %s2267_s10 }
  0xc2   :  { %p2274_p8 = por %p2273_p7, %p2272_p6 }
  0xc4   :  { %p2275_p9 = pnand %p2274_p8, %p2268_p5 }
  0xc6   :  { %2278 = shalt.err (!%p2275_p9)
}
  0xc7   :  { %145 = dma.hbm_to_vmem [thread:$0]  %s2949_s12, 32, %s140_s24, [#allocation18], %s2368_s25, %s2368_s25, %s2369_s28  }
  0xc8   :  { %s2279_s22 = scalar_lea.hbm %s2952_s15, 16 }
  0xc9   :  { %p2280_p10 = scmp.ne.s32.totalorder %s2952_s15, %s2279_s22  ;;  %p2283_p11 = scmp.lt.u32.totalorder %s2279_s22, %s2952_s15 }
  0xcb   :  { %p2285_p12 = pnand %p2283_p11, %p2280_p10 }
  0xcd   :  { %2288 = shalt.err (!%p2285_p12)
}
  0xce   :  { %s2289_s27 = scalar_lea.vmem %s165_s5, 16  ;;  %s2293_s7 = scalar_lea.vmem %s165_s5, 32 }
  0xcf   :  { %p2290_p13 = scmp.ne.s32.totalorder %s165_s5, %s2289_s27  ;;  %p2294_p0 = scmp.lt.s32.totalorder %s165_s5, %s165_s5 }
  0xd0   :  { %p2295_p1 = scmp.lt.s32.totalorder %s2293_s7, %s2289_s27 }
  0xd2   :  { %p2296_p2 = por %p2295_p1, %p2294_p0 }
  0xd4   :  { %p2297_p3 = pnand %p2296_p2, %p2290_p13 }
  0xd6   :  { %2300 = shalt.err (!%p2297_p3)
}
  0xd7   :  { %167 = dma.hbm_to_vmem [thread:$0]  %s2952_s15, 16, %s165_s5, [#allocation21]  }
  0xd8   :  { %2345 = dma.done.wait [#allocation6], 32  }
  0xd9   :  { %2346 = vsyncadd [#allocation6], 4294967264 }
  0xda   :  { %2347 = dma.done.wait [#allocation9], 320  }
  0xdb   :  { %2348 = vsyncadd [#allocation9], 4294966976 }
  0xdc   :  { %2349 = dma.done.wait [#allocation12], 32  }
  0xdd   :  { %2350 = vsyncadd [#allocation12], 4294967264 }
  0xde   :  { %2351 = dma.done.wait [#allocation15], 80  }
  0xdf   :  { %2352 = vsyncadd [#allocation15], 4294967216 }
  0xe0   :  { %2353 = dma.done.wait [#allocation18], 64  }
  0xe1   :  { %2354 = vsyncadd [#allocation18], 4294967232 }
  0xe2   :  { %2355 = dma.done.wait [#allocation21], 32  }
  0xe3   :  { %2356 = vsyncadd [#allocation21], 4294967264  ;;  %v2378_v0 = vmov 0.0|0.0   ;;  %vm2379_vm0 = vmmov 0   ;;  %v2380_v1 = vmov 0.0   ;;  %v226_v2 = vld [vmem:[#allocation10] sm:$0xff] }
  0xe4   :  { %1926 = vmatprep.subr.bf16.mxu0 %v2378_v0  ;;  %1769 = vmatprep.mubr.msk.f32.mxu0 %vm2379_vm0, %v2380_v1  ;;  %v227_v3 = vld [vmem:[#allocation10 + $0x8] sm:$0xff]  ;;  %v225_v5 = vld [vmem:[#allocation5] sm:$0x3]  ;;  %vm235_vm1 = vcmask 130048   ;;  %v1617_v6 = vld [vmem:[#allocation11] ss:$0 sm:$0xff] }
  0xe5   :  { %1929 = vmatprep.subr.bf16.mxu1 %v2378_v0  ;;  %1780 = vmatprep.mubr.msk.f32.mxu1 %vm2379_vm0, %v2380_v1  ;;  %v1927_v4 = vpack.c.bf16 %v227_v3, %v226_v2  ;;  %vm222_vm2 = vcmask 254976   ;;  %v366_v16 = vld [vmem:[%s2946_s9] sm:$0xff]  ;;  %v367_v17 = vld [vmem:[%s2946_s9 + $0x8] sm:$0xff]  ;;  %v368_v23 = vld [vmem:[%s2946_s9 + $0x10] sm:$0xff]  ;;  %vm370_vm3 = vcmask 261120   ;;  %s2973_s2 = sld [smem:[#allocation34_spill]] }
  0xe6   :  { %v1930_v18 = vpack.c.bf16 %v367_v17, %v366_v16  ;;  %v1631_v19 = vld [vmem:[%s2946_s9 + $0x20] sm:$0xff]  ;;  %v1632_v20 = vld [vmem:[%s2946_s9 + $0x28] sm:$0xff]  ;;  %v369_v24 = vld [vmem:[%s2946_s9 + $0x18] sm:$0xff]  ;;  %s2974_s21 = sld [smem:[#allocation36_spill]] }
  0xe7   :  { %1928 = vmatpush3.bf16.msra.mxu0 %v1927_v4  ;;  %v1936_v21 = vpack.c.bf16 %v1632_v20, %v1631_v19  ;;  %v220_v22 = vld [vmem:[#allocation8] sm:$0x3]  ;;  %v1933_v25 = vpack.c.bf16 %v369_v24, %v368_v23  ;;  %v1633_v26 = vld [vmem:[%s2946_s9 + $0x30] sm:$0xff]  ;;  %v1634_v27 = vld [vmem:[%s2946_s9 + $0x38] sm:$0xff] }
  0xe8   :  { %1935 = vmatprep.subr.bf16.mxu0 %v2378_v0  ;;  %1931 = vmatpush3.bf16.msra.mxu1 %v1930_v18  ;;  %223 = vst.msk [vmem:[#allocation2] sm:$0x3] %vm222_vm2, %v220_v22  ;;  %v1939_v28 = vpack.c.bf16 %v1634_v27, %v1633_v26  ;;  %v352_v29 = vld [vmem:[%s2945_s8] sm:$0xff]  ;;  %v353_v30 = vld [vmem:[%s2945_s8 + $0x8] sm:$0xff]  ;;  %v354_v36 = vld [vmem:[%s2945_s8 + $0x10] sm:$0xff] }
  0xe9   :  { %1932 = vmatprep.subr.bf16.mxu1 %v2378_v0  ;;  %v1942_v31 = vpack.c.bf16 %v353_v30, %v352_v29  ;;  %v1622_v32 = vld [vmem:[%s2945_s8 + $0x20] sm:$0xff]  ;;  %v1623_v33 = vld [vmem:[%s2945_s8 + $0x28] sm:$0xff]  ;;  %v355_v37 = vld [vmem:[%s2945_s8 + $0x18] sm:$0xff] }
  0xea   :  { %1770 = vmatmul.mubr.msk.f32.vlgmr.msra.gmra.mrb[0].mxu0 %vm235_vm1, %v225_v5  ;;  %v1948_v35 = vpack.c.bf16 %v1623_v33, %v1622_v32  ;;  %v1624_v38 = vld [vmem:[%s2945_s8 + $0x30] sm:$0xff]  ;;  %v1945_v39 = vpack.c.bf16 %v355_v37, %v354_v36  ;;  %v1625_v40 = vld [vmem:[%s2945_s8 + $0x38] sm:$0xff]  ;;  %v1626_v52 = vld [vmem:[%s2945_s8 + $0x40] sm:$0xff] }
  0xeb   :  { %1791 = vmatprep.mubr.msk.f32.mxu0 %vm2379_vm0, %v2380_v1  ;;  %1937 = vmatpush3.bf16.msra.mxu0 %v1936_v21  ;;  %v1951_v41 = vpack.c.bf16 %v1625_v40, %v1624_v38  ;;  %p212_p4 = scmp.lt.s32.totalorder %s2973_s2, 299  ;;  %v1619_v46 = vld [vmem:[#allocation13] ss:$0 sm:$0xff]  ;;  %v1620_v48 = vld [vmem:[#allocation14] ss:$0 sm:$0xff]  ;;  %v1627_v53 = vld [vmem:[%s2945_s8 + $0x48] sm:$0xff] }
  0xec   :  { %1938 = vmatprep.subr.bf16.mxu0 %v2378_v0  ;;  %1934 = vmatpush3.bf16.msra.mxu1 %v1933_v25  ;;  %v1636_v55 = vld [vmem:[%s2946_s9 + $0x40] sm:$0xff]  ;;  %v1637_v56 = vld [vmem:[%s2946_s9 + $0x48] sm:$0xff]  ;;  %v1954_v58 = vpack.c.bf16 %v1627_v53, %v1626_v52  ;;  %v1628_v60 = vld [vmem:[%s2945_s8 + $0x50] sm:$0xff] }
  0xed   :  { %1941 = vmatprep.subr.bf16.mxu1 %v2378_v0  ;;  %s2978_s2 = smov (!%p212_p4, %s2973_s2), 299  ;;  %v1629_v61 = vld [vmem:[%s2945_s8 + $0x58] sm:$0xff]  ;;  %v1960_v62 = vpack.c.bf16 %v1637_v56, %v1636_v55  ;;  %v1638_v63 = vld [vmem:[%s2946_s9 + $0x50] sm:$0xff]  ;;  %v1650_v21 = vld [vmem:[%s2945_s8 + $0x60] sm:$0xff] }
  0xee   :  { %s214_s1 = scalar_lea.vmem %s2974_s21, %s2978_s2  ;;  %v1639_v2 = vld [vmem:[%s2946_s9 + $0x58] sm:$0xff]  ;;  %v1957_v3 = vpack.c.bf16 %v1629_v61, %v1628_v60  ;;  %v1664_v16 = vld [vmem:[%s2946_s9 + $0x70] sm:$0xff]  ;;  %v1651_v23 = vld [vmem:[%s2945_s8 + $0x68] sm:$0xff] }
  0xef   :  { %1940 = vmatpush3.bf16.msra.mxu0 %v1939_v28  ;;  %v2684_v34 = vld [vmem:[#allocation2] sm:$0x3]  ;;  %v1963_v4 = vpack.c.bf16 %v1639_v2, %v1638_v63  ;;  %v1665_v17 = vld [vmem:[%s2946_s9 + $0x78] sm:$0xff]  ;;  %v1669_v18 = vld [vmem:[%s2946_s9 + $0x90] sm:$0xff]  ;;  %v1978_v26 = vpack.c.bf16 %v1651_v23, %v1650_v21 }
  0xf0   :  { %1947 = vmatprep.subr.bf16.mxu0 %v2378_v0  ;;  %1781 = vmatmul.mubr.msk.f32.vlgmr.msra.gmra.mrb[0].mxu1 %vm370_vm3, %v2684_v34  ;;  %v1621_v51 = vld [vmem:[%s214_s1] ss:$0 sm:$0xff]  ;;  %v1969_v19 = vpack.c.bf16 %v1665_v17, %v1664_v16  ;;  %v1670_v20 = vld [vmem:[%s2946_s9 + $0x98] sm:$0xff]  ;;  %v1655_v25 = vld [vmem:[%s2945_s8 + $0x88] sm:$0xff] }
  0xf1   :  { %1943 = vmatpush3.bf16.msra.mxu1 %v1942_v31  ;;  %1802 = vmatprep.mubr.msk.f32.mxu1 %vm2379_vm0, %v2380_v1  ;;  %v1975_v22 = vpack.c.bf16 %v1670_v20, %v1669_v18  ;;  %v1654_v24 = vld [vmem:[%s2945_s8 + $0x80] sm:$0xff]  ;;  %v1652_v28 = vld [vmem:[%s2945_s8 + $0x70] sm:$0xff]  ;;  %v1653_v29 = vld [vmem:[%s2945_s8 + $0x78] sm:$0xff] }
  0xf2   :  { %1792 = vmatmul.mubr.msk.f32.vlgmr.msra.gmra.mrb[2].mxu0 %vm370_vm3, %v2684_v34  ;;  %1944 = vmatprep.subr.bf16.mxu1 %v2378_v0  ;;  %v1984_v27 = vpack.c.bf16 %v1655_v25, %v1654_v24  ;;  %v1656_v30 = vld [vmem:[%s2945_s8 + $0x90] sm:$0xff]  ;;  %v1657_v31 = vld [vmem:[%s2945_s8 + $0x98] sm:$0xff]  ;;  %v1981_v33 = vpack.c.bf16 %v1653_v29, %v1652_v28  ;;  %v1641_v37 = vld [vmem:[#allocation16] ss:$0 sm:$0xff] }
  0xf3   :  { %1949 = vmatpush3.bf16.msra.mxu0 %v1948_v35  ;;  %1813 = vmatprep.mubr.msk.f32.mxu0 %vm2379_vm0, %v2380_v1  ;;  %v1987_v35 = vpack.c.bf16 %v1657_v31, %v1656_v30  ;;  %v1648_v55 = vld [vmem:[#allocation19] ss:$0 sm:$0xff]  ;;  %v1675_v16 = vld [vmem:[%s2946_s9 + $0xb8] sm:$0xff]  ;;  %v1371_v24 = vld [vmem:[%s2950_s13 + $0x8] sm:$0xff] }
  0xf4   :  { %1950 = vmatprep.subr.bf16.mxu0 %v2378_v0  ;;  %v1370_v23 = vld [vmem:[%s2950_s13] sm:$0xff]  ;;  %v1372_v25 = vld [vmem:[%s2950_s13 + $0x10] sm:$0xff] }
  0xf5   :  { %1946 = vmatpush3.bf16.msra.mxu1 %v1945_v39  ;;  %v1677_v29 = vld [vmem:[#allocation16 + $0x2] ss:$0 sm:$0xff] }
  0xf6   :  { %1953 = vmatprep.subr.bf16.mxu1 %v2378_v0 }
  0xf7   :  { %1952 = vmatpush3.bf16.msra.mxu0 %v1951_v41 }
  0xf8   :  { %1959 = vmatprep.subr.bf16.mxu0 %v2378_v0 }
 0x1bd   :  { %v305_v7 = vpop.f32.mrb[0].mxu0 }
 0x1be   :  { %v306_v8 = vadd.f32 %v1617_v6, %v305_v7  ;;  %v1771_v9 = vpop.f32.mrb[1].mxu0 }
 0x1bf   :  { %v1662_v9 = vld [vmem:[%s2946_s9 + $0x60] sm:$0xff] }
 0x1c0   :  { %v312_v10 = vsel %vm222_vm2, %v306_v8, 0.0 }
 0x1c1   :  { %313 = vadd.xlane.f32.xlu0 %v312_v10  ;;  %v1663_v10 = vld [vmem:[%s2946_s9 + $0x68] sm:$0xff] }
 0x1c3   :  { %v440_v5 = vpop.f32.mrb[0].mxu1 }
 0x1c4   :  { %v1782_v7 = vpop.f32.mrb[1].mxu1 }
 0x1c5   :  { %v515_v6 = vpop.f32.mrb[2].mxu0  ;;  %v1673_v7 = vld [vmem:[%s2946_s9 + $0xa8] sm:$0xff] }
 0x24e   :  { %v314_v11 = vpop.xlane.xlu0 %313 }
 0x24f   :  { %v316_v12 = vmul.f32 0.03125, %v314_v11  ;;  %v1966_v11 = vpack.c.bf16 %v1663_v10, %v1662_v9 }
 0x251   :  { %v317_v13 = vsub.f32 %v306_v8, %v316_v12  ;;  %v1793_v8 = vpop.f32.mrb[3].mxu0  ;;  %v1667_v12 = vld [vmem:[%s2946_s9 + $0x80] sm:$0xff] }
 0x253   :  { %v318_v14 = vmul.f32 %v317_v13, %v317_v13 }
 0x255   :  { %v319_v15 = vsel %vm222_vm2, %v318_v14, 0.0 }
 0x256   :  { %320 = vadd.xlane.f32.xlu0 %v319_v15  ;;  %v221_v15 = vld [vmem:[#allocation8 + $0x2] sm:$0x3] }
 0x257   :  { %224 = vst.msk [vmem:[#allocation2 + $0x2] sm:$0x3] %vm222_vm2, %v221_v15  ;;  %v1674_v15 = vld [vmem:[%s2946_s9 + $0xb0] sm:$0xff] }
 0x258   :  { %v1999_v17 = vpack.c.bf16 %v1675_v16, %v1674_v15  ;;  %v1489_v15 = vld [vmem:[%s2954_s17 + $0x18] sm:$0xff] }
 0x25e   :  { %v2813_v32 = vld [vmem:[#allocation2 + $0x2] sm:$0x3] }
 0x2e3   :  { %v321_v42 = vpop.xlane.xlu0 %320 }
 0x2e4   :  { %v322_v43 = vmul.f32 0.03125, %v321_v42 }
 0x2e6   :  { %v323_v44 = vadd.f32 1e-05, %v322_v43 }
 0x2e8   :  { %2035 = vrsqrt.f32 %v323_v44  ;;  %v1644_v44 = vld [vmem:[#allocation16 + $0x1] ss:$0 sm:$0xff] }
 0x2f2   :  { %v2036_v45 = vpop.eup %2035 }
 0x2f3   :  { %v325_v47 = vmul.f32 %v2036_v45, %v317_v13  ;;  %v1668_v13 = vld [vmem:[%s2946_s9 + $0x88] sm:$0xff] }
 0x2f4   :  { %v1972_v14 = vpack.c.bf16 %v1668_v13, %v1667_v12  ;;  %v1660_v12 = vld [vmem:[%s2945_s8 + $0xb0] sm:$0xff]  ;;  %v1661_v13 = vld [vmem:[%s2945_s8 + $0xb8] sm:$0xff] }
 0x2f5   :  { %v332_v49 = vmul.f32 %v1619_v46, %v325_v47 }
 0x2f7   :  { %v339_v50 = vadd.f32 %v1620_v48, %v332_v49 }
 0x2f9   :  { %vm340_vm4 = vcmp.gt.f32.partialorder %v339_v50, 0.0  ;;  %v341_v54 = vmul.f32 0.2, %v339_v50 }
 0x2fb   :  { %v342_v57 = vsel %vm340_vm4, %v339_v50, %v341_v54 }
 0x2fc   :  { %v350_v59 = vadd.f32 %v1621_v51, %v342_v57 }
 0x2fe   :  { %1803 = vmatmul.mubr.msk.f32.vlgmr.msra.gmra.mrb[2].mxu1 %vm370_vm3, %v350_v59  ;;  %1814 = vmatmul.mubr.msk.f32.vlgmr.msra.gmra.mrb[4].mxu0 %vm370_vm3, %v350_v59 }
 0x2ff   :  { %1955 = vmatpush3.bf16.msra.mxu1 %v1954_v58  ;;  %1824 = vmatprep.mubr.msk.f32.mxu1 %vm2379_vm0, %v2380_v1  ;;  %v1646_v58 = vld [vmem:[#allocation17] ss:$0 sm:$0xff] }
 0x300   :  { %1956 = vmatprep.subr.bf16.mxu1 %v2378_v0  ;;  %1961 = vmatpush3.bf16.msra.mxu0 %v1960_v62 }
 0x301   :  { %1962 = vmatprep.subr.bf16.mxu0 %v2378_v0  ;;  %1835 = vmatprep.mubr.msk.f32.mxu0 %vm2379_vm0, %v2380_v1 }
 0x303   :  { %1958 = vmatpush3.bf16.msra.mxu1 %v1957_v3  ;;  %v1658_v3 = vld [vmem:[%s2945_s8 + $0xa0] sm:$0xff] }
 0x304   :  { %1964 = vmatpush3.bf16.msra.mxu0 %v1963_v4  ;;  %1965 = vmatprep.subr.bf16.mxu1 %v2378_v0  ;;  %v1659_v4 = vld [vmem:[%s2945_s8 + $0xa8] sm:$0xff] }
 0x305   :  { %1971 = vmatprep.subr.bf16.mxu0 %v2378_v0  ;;  %v1990_v10 = vpack.c.bf16 %v1659_v4, %v1658_v3 }
 0x306   :  { %1825 = vmatmul.mubr.msk.f32.vlgmr.msra.gmra.mrb[4].mxu1 %vm370_vm3, %v350_v59 }
 0x307   :  { %1836 = vmatmul.mubr.msk.f32.vlgmr.msra.gmra.mrb[6].mxu0 %vm370_vm3, %v2684_v34  ;;  %1846 = vmatprep.mubr.msk.f32.mxu1 %vm2379_vm0, %v2380_v1 }
 0x308   :  { %1857 = vmatprep.mubr.msk.f32.mxu0 %vm2379_vm0, %v2380_v1  ;;  %1967 = vmatpush3.bf16.msra.mxu1 %v1966_v11 }
 0x309   :  { %1973 = vmatpush3.bf16.msra.mxu0 %v1972_v14  ;;  %1968 = vmatprep.subr.bf16.mxu1 %v2378_v0 }
 0x30a   :  { %1974 = vmatprep.subr.bf16.mxu0 %v2378_v0 }
 0x30c   :  { %1970 = vmatpush3.bf16.msra.mxu1 %v1969_v19 }
 0x30d   :  { %1976 = vmatpush3.bf16.msra.mxu0 %v1975_v22  ;;  %1977 = vmatprep.subr.bf16.mxu1 %v2378_v0 }
 0x30e   :  { %1983 = vmatprep.subr.bf16.mxu0 %v2378_v0 }
 0x30f   :  { %1847 = vmatmul.mubr.msk.f32.vlgmr.msra.gmra.mrb[6].mxu1 %vm370_vm3, %v2813_v32 }
 0x310   :  { %1858 = vmatmul.mubr.msk.f32.vlgmr.msra.gmra.mrb[8].mxu0 %vm370_vm3, %v2813_v32  ;;  %1979 = vmatpush3.bf16.msra.mxu1 %v1978_v26  ;;  %v2002_v26 = vpack.c.bf16 %v1371_v24, %v1370_v23 }
 0x311   :  { %1985 = vmatpush3.bf16.msra.mxu0 %v1984_v27  ;;  %1980 = vmatprep.subr.bf16.mxu1 %v2378_v0 }
 0x312   :  { %1986 = vmatprep.subr.bf16.mxu0 %v2378_v0  ;;  %1868 = vmatprep.mubr.msk.f32.mxu1 %vm2379_vm0, %v2380_v1 }
 0x313   :  { %1879 = vmatprep.mubr.msk.f32.mxu0 %vm2379_vm0, %v2380_v1 }
 0x314   :  { %1982 = vmatpush3.bf16.msra.mxu1 %v1981_v33 }
 0x315   :  { %1988 = vmatpush3.bf16.msra.mxu0 %v1987_v35  ;;  %1989 = vmatprep.subr.bf16.mxu1 %v2378_v0 }
 0x316   :  { %1995 = vmatprep.subr.bf16.mxu0 %v2378_v0 }
 0x3d1   :  { %v593_v36 = vpop.f32.mrb[2].mxu1  ;;  %v677_v38 = vpop.f32.mrb[4].mxu0 }
 0x3d2   :  { %v594_v39 = vadd.f32 %v593_v36, %v440_v5  ;;  %v678_v40 = vadd.f32 %v677_v38, %v515_v6  ;;  %v1804_v41 = vpop.f32.mrb[3].mxu1  ;;  %v1815_v42 = vpop.f32.mrb[5].mxu0  ;;  %v1672_v6 = vld [vmem:[%s2946_s9 + $0xa0] sm:$0xff] }
 0x3d3   :  { %v1996_v14 = vpack.c.bf16 %v1673_v7, %v1672_v6  ;;  %v1680_v38 = vld [vmem:[#allocation16 + $0x3] ss:$0 sm:$0xff] }
 0x3d4   :  { %v604_v43 = vadd.f32 %v1641_v37, %v594_v39  ;;  %v689_v46 = vadd.f32 %v1644_v44, %v678_v40 }
 0x3d6   :  { %v1642_v45 = vmul.f32 -1.442695, %v604_v43  ;;  %v1645_v50 = vmul.f32 -1.442695, %v689_v46 }
 0x3d8   :  { %2037 = vpow2.f32 %v1642_v45 }
 0x3d9   :  { %v769_v47 = vpop.f32.mrb[4].mxu1  ;;  %2039 = vpow2.f32 %v1645_v50 }
 0x3da   :  { %v1826_v48 = vpop.f32.mrb[5].mxu1  ;;  %v846_v49 = vpop.f32.mrb[6].mxu0  ;;  %v770_v60 = vadd.f32 %v1646_v58, %v769_v47 }
 0x3db   :  { %v1837_v51 = vpop.f32.mrb[7].mxu0  ;;  %v847_v57 = vadd.f32 %v1648_v55, %v846_v49  ;;  %v1684_v49 = vld [vmem:[#allocation19 + $0x1] ss:$0 sm:$0xff] }
 0x3e2   :  { %v2038_v52 = vpop.eup %2037  ;;  %v949_v19 = vpop.f32.mrb[6].mxu1 }
 0x3e3   :  { %v608_v53 = vadd.f32 1.0, %v2038_v52  ;;  %v2040_v54 = vpop.eup %2039  ;;  %v1024_v20 = vpop.f32.mrb[8].mxu0  ;;  %v1682_v52 = vld [vmem:[#allocation17 + $0x1] ss:$0 sm:$0xff] }
 0x3e4   :  { %v693_v56 = vadd.f32 1.0, %v2040_v54  ;;  %v1848_v21 = vpop.f32.mrb[7].mxu1  ;;  %v1859_v22 = vpop.f32.mrb[9].mxu0 }
 0x3e5   :  { %2041 = vrcp.f32 %v608_v53  ;;  %v1689_v22 = vld [vmem:[%s2953_s16] ss:$0 sm:$0xff] }
 0x3e6   :  { %2043 = vrcp.f32 %v693_v56 }
 0x3ef   :  { %v2042_v59 = vpop.eup %2041 }
 0x3f0   :  { %v850_v61 = vmul.f32 %v2042_v59, %v847_v57  ;;  %v2044_v63 = vpop.eup %2043 }
 0x3f1   :  { %v853_v2 = vsub.f32 1.0, %v2044_v63  ;;  %v855_v9 = vmul.f32 %v2044_v63, %v2684_v34  ;;  %v1993_v34 = vpack.c.bf16 %v1661_v13, %v1660_v12  ;;  %v1487_v12 = vld [vmem:[%s2954_s17 + $0x8] sm:$0xff]  ;;  %v1488_v13 = vld [vmem:[%s2954_s17 + $0x10] sm:$0xff] }
 0x3f2   :  { %v851_v62 = vadd.f32 %v850_v61, %v770_v60  ;;  %v2011_v16 = vpack.c.bf16 %v1489_v15, %v1488_v13 }
 0x3f4   :  { %2045 = vtanh.f32 %v851_v62 }
 0x3fe   :  { %v2046_v5 = vpop.eup %2045 }
 0x3ff   :  { %v854_v8 = vmul.f32 %v2046_v5, %v853_v2  ;;  %v1686_v2 = vld [vmem:[#allocation20] ss:$0 sm:$0xff] }
 0x401   :  { %v856_v11 = vadd.f32 %v855_v9, %v854_v8 }
 0x403   :  { %857 = vst.msk [vmem:[#allocation2] sm:$0x3] %vm222_vm2, %v856_v11  ;;  %1869 = vmatmul.mubr.msk.f32.vlgmr.msra.gmra.mrb[8].mxu1 %vm370_vm3, %v856_v11  ;;  %1880 = vmatmul.mubr.msk.f32.vlgmr.msra.gmra.mrb[10].mxu0 %vm370_vm3, %v856_v11 }
 0x404   :  { %1991 = vmatpush3.bf16.msra.mxu1 %v1990_v10  ;;  %1890 = vmatprep.mubr.msk.f32.mxu1 %vm2379_vm0, %v2380_v1 }
 0x405   :  { %1992 = vmatprep.subr.bf16.mxu1 %v2378_v0  ;;  %1997 = vmatpush3.bf16.msra.mxu0 %v1996_v14 }
 0x406   :  { %1998 = vmatprep.subr.bf16.mxu0 %v2378_v0  ;;  %1901 = vmatprep.mubr.msk.f32.mxu0 %vm2379_vm0, %v2380_v1 }
 0x408   :  { %1994 = vmatpush3.bf16.msra.mxu1 %v1993_v34 }
 0x409   :  { %2000 = vmatpush3.bf16.msra.mxu0 %v1999_v17  ;;  %2001 = vmatprep.subr.bf16.mxu1 %v2378_v0 }
 0x40a   :  { %2007 = vmatprep.subr.bf16.mxu0 %v2378_v0  ;;  %v1574_v18 = vld [vmem:[#allocation2] sm:$0x3] }
 0x40b   :  { %1891 = vmatmul.mubr.msk.f32.vlgmr.msra.gmra.mrb[10].mxu1 %vm370_vm3, %v856_v11  ;;  %1576 = vst.msk [vmem:[#allocation24] sm:$0x3] %vm222_vm2, %v1574_v18  ;;  %v1486_v11 = vld [vmem:[%s2954_s17] sm:$0xff]  ;;  %s2381_s17 = smov [#allocation24]  }
 0x40c   :  { %1902 = vmatmul.mubr.msk.f32.vlgmr.msra.gmra.mrb[12].mxu0 %vm370_vm3, %v2813_v32  ;;  %1912 = vmatprep.mubr.msk.f32.mxu1 %vm2379_vm0, %v2380_v1  ;;  %v2008_v14 = vpack.c.bf16 %v1487_v12, %v1486_v11  ;;  %s1593_s19 = sshll.u32 %s2381_s17, 4  ;;  %s1594_s19 = int_to_ptr.vmem [resolvable:$true] %s1593_s19 }
 0x40d   :  { %1923 = vmatprep.mubr.msk.f32.mxu0 %vm2379_vm0, %v2380_v1  ;;  %v1373_v1 = vld [vmem:[%s2950_s13 + $0x18] sm:$0xff]  ;;  %2003 = vmatpush3.bf16.msra.mxu1 %v2002_v26  ;;  %s2301_s3 = scalar_lea.vmem %s1594_s19, 64  ;;  %p2306_p6 = scmp.lt.s32.totalorder %s1594_s19, %s1594_s19 }
 0x40e   :  { %v2005_v27 = vpack.c.bf16 %v1373_v1, %v1372_v25  ;;  %2004 = vmatprep.subr.bf16.mxu1 %v2378_v0  ;;  %2009 = vmatpush3.bf16.msra.mxu0 %v2008_v14  ;;  %p2302_p5 = scmp.ne.s32.totalorder %s1594_s19, %s2301_s3  ;;  %p2307_p7 = scmp.lt.s32.totalorder %s2301_s3, %s2301_s3 }
 0x40f   :  { %2010 = vmatprep.subr.bf16.mxu0 %v2378_v0 }
 0x410   :  { %p2308_p8 = por %p2307_p7, %p2306_p6 }
 0x411   :  { %2006 = vmatpush3.bf16.msra.mxu1 %v2005_v27 }
 0x412   :  { %2012 = vmatpush3.bf16.msra.mxu0 %v2011_v16  ;;  %p2309_p9 = pnand %p2308_p8, %p2302_p5 }
 0x4d6   :  { %v1102_v28 = vpop.f32.mrb[8].mxu1  ;;  %v1187_v30 = vpop.f32.mrb[10].mxu0 }
 0x4d7   :  { %v1103_v31 = vadd.f32 %v1102_v28, %v949_v19  ;;  %v1188_v33 = vadd.f32 %v1187_v30, %v1024_v20  ;;  %v1870_v35 = vpop.f32.mrb[9].mxu1  ;;  %v1881_v36 = vpop.f32.mrb[11].mxu0  ;;  %v1688_v20 = vld [vmem:[#allocation22] ss:$0 sm:$0xff] }
 0x4d9   :  { %v1114_v37 = vadd.f32 %v1677_v29, %v1103_v31  ;;  %v1199_v40 = vadd.f32 %v1680_v38, %v1188_v33 }
 0x4db   :  { %v1678_v39 = vmul.f32 -1.442695, %v1114_v37  ;;  %v1681_v44 = vmul.f32 -1.442695, %v1199_v40 }
 0x4dd   :  { %2047 = vpow2.f32 %v1678_v39 }
 0x4de   :  { %v1280_v41 = vpop.f32.mrb[10].mxu1  ;;  %2049 = vpow2.f32 %v1681_v44 }
 0x4df   :  { %v1892_v42 = vpop.f32.mrb[11].mxu1  ;;  %v1358_v43 = vpop.f32.mrb[12].mxu0  ;;  %v1281_v54 = vadd.f32 %v1682_v52, %v1280_v41 }
 0x4e0   :  { %v1903_v45 = vpop.f32.mrb[13].mxu0  ;;  %v1359_v51 = vadd.f32 %v1684_v49, %v1358_v43 }
 0x4e7   :  { %v2048_v46 = vpop.eup %2047 }
 0x4e8   :  { %v1118_v47 = vadd.f32 1.0, %v2048_v46  ;;  %v2050_v48 = vpop.eup %2049 }
 0x4e9   :  { %v1203_v50 = vadd.f32 1.0, %v2050_v48 }
 0x4ea   :  { %2051 = vrcp.f32 %v1118_v47 }
 0x4eb   :  { %2053 = vrcp.f32 %v1203_v50 }
 0x4f4   :  { %v2052_v53 = vpop.eup %2051 }
 0x4f5   :  { %v1362_v55 = vmul.f32 %v2052_v53, %v1359_v51  ;;  %v2054_v57 = vpop.eup %2053 }
 0x4f6   :  { %v1365_v58 = vsub.f32 1.0, %v2054_v57  ;;  %v1367_v61 = vmul.f32 %v2054_v57, %v2813_v32 }
 0x4f7   :  { %v1363_v56 = vadd.f32 %v1362_v55, %v1281_v54 }
 0x4f9   :  { %2055 = vtanh.f32 %v1363_v56 }
 0x503   :  { %v2056_v59 = vpop.eup %2055 }
 0x504   :  { %v1366_v60 = vmul.f32 %v2056_v59, %v1365_v58 }
 0x506   :  { %v1368_v62 = vadd.f32 %v1367_v61, %v1366_v60 }
 0x508   :  { %1369 = vst.msk [vmem:[#allocation2 + $0x2] sm:$0x3] %vm222_vm2, %v1368_v62  ;;  %1913 = vmatmul.mubr.msk.f32.vlgmr.msra.gmra.mrb[12].mxu1 %vm370_vm3, %v1368_v62 }
 0x50f   :  { %v1575_v63 = vld [vmem:[#allocation2 + $0x2] sm:$0x3] }
 0x510   :  { %1577 = vst.msk [vmem:[#allocation24 + $0x2] sm:$0x3] %vm222_vm2, %v1575_v63 }
 0x5db   :  { %v1450_v3 = vpop.f32.mrb[12].mxu1 }
 0x5dc   :  { %v1451_v4 = vadd.f32 %v1686_v2, %v1450_v3  ;;  %v1914_v5 = vpop.f32.mrb[13].mxu1 }
 0x5de   :  { %v1456_v6 = vsel %vm222_vm2, %v1451_v4, 0.0 }
 0x5df   :  { %1457 = vadd.xlane.f32.xlu1 %v1456_v6 }
 0x66c   :  { %v1458_v7 = vpop.xlane.xlu1 %1457 }
 0x66d   :  { %v1459_v8 = vmul.f32 0.03125, %v1458_v7 }
 0x66f   :  { %v1460_v9 = vsub.f32 %v1451_v4, %v1459_v8 }
 0x671   :  { %v1461_v10 = vmul.f32 %v1460_v9, %v1460_v9 }
 0x673   :  { %v1462_v32 = vsel %vm222_vm2, %v1461_v10, 0.0 }
 0x674   :  { %1463 = vadd.xlane.f32.xlu1 %v1462_v32 }
 0x701   :  { %v1464_v34 = vpop.xlane.xlu1 %1463 }
 0x702   :  { %v1465_v17 = vmul.f32 0.03125, %v1464_v34 }
 0x704   :  { %v1466_v18 = vadd.f32 1e-05, %v1465_v17 }
 0x706   :  { %2057 = vrsqrt.f32 %v1466_v18 }
 0x710   :  { %v2058_v19 = vpop.eup %2057 }
 0x711   :  { %v1468_v21 = vmul.f32 %v2058_v19, %v1460_v9 }
 0x713   :  { %v1475_v23 = vmul.f32 %v1688_v20, %v1468_v21 }
 0x715   :  { %v1482_v24 = vadd.f32 %v1689_v22, %v1475_v23 }
 0x717   :  { %vm1483_vm5 = vcmp.gt.f32.partialorder %v1482_v24, 0.0  ;;  %v1484_v25 = vmul.f32 0.2, %v1482_v24 }
 0x719   :  { %v1485_v26 = vsel %vm1483_vm5, %v1482_v24, %v1484_v25 }
 0x71a   :  { %1924 = vmatmul.mubr.msk.f32.vlgmr.msra.gmra.mrb[14].mxu0 %vm370_vm3, %v1485_v26 }
 0x71b   :  { %2312 = shalt.err (!%p2309_p9)
}
 0x71c   :  { %s2313_s16 = scalar_lea.hbm %s2957_s20, 64 }
 0x71d   :  { %p2314_p10 = scmp.ne.s32.totalorder %s2957_s20, %s2313_s16  ;;  %p2317_p11 = scmp.lt.u32.totalorder %s2313_s16, %s2957_s20 }
 0x71f   :  { %p2319_p12 = pnand %p2317_p11, %p2314_p10 }
 0x721   :  { %2322 = shalt.err (!%p2319_p12)
}
 0x722   :  { %1599 = dma.vmem_to_hbm [thread:$0]  %s1594_s19, 64, %s2957_s20, [#allocation25], %s2362_s29, %s2362_s29, %s2363_s30  }
 0x723   :  { %s2975_s6 = sld [smem:[#allocation39_spill]]  ;;  %s2382_s21 = smov [#allocation23]  }
 0x724   :  { %s1584_s1 = sshll.u32 %s2382_s21, 4  ;;  %s1585_s1 = int_to_ptr.vmem [resolvable:$true] %s1584_s1 }
 0x725   :  { %s2323_s18 = scalar_lea.vmem %s1585_s1, 32  ;;  %p2328_p0 = scmp.lt.s32.totalorder %s1585_s1, %s1585_s1 }
 0x726   :  { %p2324_p13 = scmp.ne.s32.totalorder %s1585_s1, %s2323_s18  ;;  %p2329_p1 = scmp.lt.s32.totalorder %s2323_s18, %s2323_s18 }
 0x728   :  { %p2330_p2 = por %p2329_p1, %p2328_p0 }
 0x729   :  { %v1690_v0 = vld [vmem:[%s2975_s6] ss:$0 sm:$0xff] }
 0x72a   :  { %p2331_p3 = pnand %p2330_p2, %p2324_p13 }
 0x7ed   :  { %v1566_v1 = vpop.f32.mrb[14].mxu0 }
 0x7ee   :  { %v1567_v27 = vadd.f32 %v1690_v0, %v1566_v1  ;;  %v1925_v28 = vpop.f32.mrb[15].mxu0 }
 0x7f0   :  { %1570 = vst [vmem:[#allocation23] sm:$0x3] %v1567_v27 }
 0x7f1   :  { %2334 = shalt.err (!%p2331_p3)
}
 0x7f2   :  { %s2976_s29 = sld [smem:[#allocation40_spill]] }
 0x7f8   :  { %s2335_s30 = scalar_lea.hbm %s2976_s29, 32 }
 0x7f9   :  { %p2336_p4 = scmp.ne.s32.totalorder %s2976_s29, %s2335_s30  ;;  %p2339_p5 = scmp.lt.u32.totalorder %s2335_s30, %s2976_s29 }
 0x7fb   :  { %p2341_p6 = pnand %p2339_p5, %p2336_p4 }
 0x7fd   :  { %2344 = shalt.err (!%p2341_p6)
}
 0x7fe   :  { %1587 = dma.vmem_to_hbm [thread:$0]  %s1585_s1, 32, %s2976_s29, [#allocation7]  }
 0x7ff   :  { %2357 = dma.done.wait [#allocation7], 32  }
 0x800   :  { %2358 = vsyncadd [#allocation7], 4294967264 }
 0x801   :  { %2359 = dma.done.wait [#allocation25], 64  }
 0x802   :  { %2360 = vsyncadd [#allocation25], 4294967232 }
 0x803   :  { %1606 = vsyncpa [#allocation6], 1 }
 0x804   :  { %1607 = vsyncpa [#allocation9], 1 }
 0x805   :  { %1608 = vsyncpa [#allocation12], 1 }
 0x806   :  { %1609 = vsyncpa [#allocation15], 1 }
 0x807   :  { %1610 = vsyncpa [#allocation18], 1 }
 0x808   :  { %1611 = vsyncpa [#allocation21], 1 }
 0x809   :  { %1612 = vsyncpa [#allocation7], 1 }
 0x80a   :  { %1613 = vsyncpa [#allocation25], 1 }

</bundles_post_ra>
